<compile_context>
chip_gen: v5e
topology: v5e:2x2
jax: 0.10.0
libtpu: 0.0.40
codegen_flags: <defaults>
</compile_context>

<pallas_src>
import functools
import math

import jax
import jax.numpy as jnp
from jax.experimental import pallas as pl
from jax.experimental.pallas import tpu as pltpu


def _mha_kernel(valid_len_ref, x_ref, wqkv_ref, o_ref, acc_ref,
                *, num_heads, head_size, batch_block, seq_len, mxu_dtype):
    bt, s = batch_block, seq_len
    d_out = num_heads * head_size

    x = x_ref[...]                                     # (Bt, S, Din) f32
    w = wqkv_ref[...]                                  # (Din, 3*Dout) mxu_dtype

    # ---- Fused QKV projection: one MXU pass with M = Bt*S rows. ----
    x2 = x.reshape(bt * s, x.shape[-1]).astype(mxu_dtype)
    qkv = jnp.dot(x2, w, preferred_element_type=jnp.float32)      # (Bt*S, 3*Dout) f32
    qkv = qkv.reshape(bt, s, 3 * d_out)

    # Fold the softmax scale into q (far fewer VPU mults than scaling (S,S) logits).
    q = qkv[:, :, 0:d_out] * (1.0 / math.sqrt(head_size))         # f32
    k = qkv[:, :, d_out:2 * d_out]
    v = qkv[:, :, 2 * d_out:3 * d_out]

    # ---- Additive key-padding mask built in-kernel (f32, no HBM traffic). ----
    b0 = pl.program_id(0) * bt
    key_pos = jax.lax.broadcasted_iota(jnp.int32, (1, s), 1)      # (1, S)
    rows = []
    for bb in range(bt):                                          # bt is small & static
        vl = valid_len_ref[b0 + bb]                               # SMEM scalar read
        rows.append(jnp.where(key_pos >= vl, -1e9, 0.0).astype(jnp.float32))
    add_mask = jnp.concatenate(rows, axis=0)[:, None, :]          # (Bt, 1, S)

    # ---- Per-head attention (static unroll; num_heads is small). ----
    for h in range(num_heads):
        lo = h * head_size
        hi = lo + head_size
        qh = q[:, :, lo:hi].astype(mxu_dtype)                     # (Bt, S, Dh)
        kh = k[:, :, lo:hi].astype(mxu_dtype)
        vh = v[:, :, lo:hi].astype(mxu_dtype)

        # Batched QK^T: lowers to dot_general contracting the last dims
        # (no materialized transpose of k).
        logits = jnp.einsum("bqd,bkd->bqk", qh, kh,
                            preferred_element_type=jnp.float32)   # (Bt, S, S) f32
        logits = logits + add_mask

        # Numerically stable softmax, all elementwise math in f32.
        m = jnp.max(logits, axis=-1, keepdims=True)
        p = jnp.exp(logits - m)
        denom = jnp.sum(p, axis=-1, keepdims=True)

        # PV matmul first, then normalize: an (S,Dh) multiply + EUP approx
        # reciprocal instead of an (S,S) VPU divide. Same math.
        pv = jnp.einsum("bqk,bkd->bqd", p.astype(mxu_dtype), vh,
                        preferred_element_type=jnp.float32)       # (Bt, S, Dh) f32
        acc_ref[:, :, lo:hi] = pv * pl.reciprocal(denom, approx=True)

    # One lane-dense store of the merged-heads tile.
    o_ref[...] = acc_ref[...].astype(o_ref.dtype)


def multi_head_attention_forward(x, wq, wk, wv, valid_len=None, *,
                                 num_heads, head_size,
                                 mxu_dtype=jnp.bfloat16, batch_block=None):
    """Pallas equivalent of MultiHeadAttention.forward.

    x:         f32 [B, S, inputsize]
    wq/wk/wv:  f32 [inputsize, num_heads*head_size]  (== nn.Linear weight, transposed)
    valid_len: int32 [B] number of valid (unmasked) keys per batch, or None
               (equivalent to the module's additive -1e9 key-padding mask).
    returns:   f32 [B, S, num_heads*head_size]
    """
    b, s, d_in = x.shape
    d_out = num_heads * head_size
    assert wq.shape == (d_in, d_out) and wk.shape == (d_in, d_out) \
        and wv.shape == (d_in, d_out)

    if valid_len is None:
        valid_len = jnp.full((b,), s, dtype=jnp.int32)
    valid_len = valid_len.astype(jnp.int32)

    # Fused projection weight; MXU operands in bf16 (or f32 for verification).
    w_qkv = jnp.concatenate([wq, wk, wv], axis=1).astype(mxu_dtype)

    # Block several batch elements per grid step so the projection matmul sees
    # M = batch_block * S rows (better MXU occupancy), bounded by a crude VMEM guard.
    if batch_block is None:
        batch_block = min(b, max(1, -(-256 // s)))
        while batch_block > 1 and \
                4 * batch_block * s * (d_in + 4 * d_out + s) > 8 * 1024 * 1024:
            batch_block -= 1
    while b % batch_block:
        batch_block -= 1
    grid = (b // batch_block,)

    kernel = functools.partial(
        _mha_kernel, num_heads=num_heads, head_size=head_size,
        batch_block=batch_block, seq_len=s, mxu_dtype=mxu_dtype)

    def run(single_buffer_weights):
        if single_buffer_weights:
            # Constant-index block: single-buffering frees its second VMEM copy.
            w_spec = pl.BlockSpec((d_in, 3 * d_out), lambda i, vl: (0, 0),
                                  pipeline_mode=pl.Buffered(1))
        else:
            w_spec = pl.BlockSpec((d_in, 3 * d_out), lambda i, vl: (0, 0))

        grid_spec = pltpu.PrefetchScalarGridSpec(
            num_scalar_prefetch=1,                     # valid_len -> SMEM
            grid=grid,
            in_specs=[
                pl.BlockSpec((batch_block, s, d_in), lambda i, vl: (i, 0, 0)),
                w_spec,
            ],
            out_specs=pl.BlockSpec((batch_block, s, d_out),
                                   lambda i, vl: (i, 0, 0)),
            scratch_shapes=[pltpu.VMEM((batch_block, s, d_out), jnp.float32)],
        )
        out = pl.pallas_call(
            kernel,
            out_shape=jax.ShapeDtypeStruct((b, s, d_out), x.dtype),
            grid_spec=grid_spec,
            compiler_params=pltpu.CompilerParams(
                dimension_semantics=("parallel",)),    # batch blocks independent
        )(valid_len, x, w_qkv)
        return jax.block_until_ready(out)

    try:
        return run(True)
    except Exception:
        # Fallback for JAX versions without single-buffered pipeline_mode support.
        return run(False)


def multi_head_attention_reference(x, wq, wk, wv, valid_len, *, num_heads, head_size):
    b, s, d_in = x.shape
    d_out = num_heads * head_size
    q = x @ wq
    k = x @ wk
    v = x @ wv

    def split(t):
        return t.reshape(b, s, num_heads, head_size).transpose(0, 2, 1, 3)

    q, k, v = split(q), split(k), split(v)
    logits = jnp.einsum("bhqd,bhkd->bhqk", q, k) / math.sqrt(head_size)
    if valid_len is not None:
        pad = jnp.arange(s)[None, :] >= valid_len[:, None]        # (B, S)
        logits = logits + jnp.where(pad, -1e9, 0.0)[:, None, None, :]
    w = jax.nn.softmax(logits, axis=-1)
    out = jnp.einsum("bhqk,bhkd->bhqd", w, v)
    return out.transpose(0, 2, 1, 3).reshape(b, s, d_out)


if __name__ == "__main__":
    # Small shapes consistent with the module:
    #   batch=2, seq=8, inputsize=32, num_heads=4, head_size=8 -> output_dim=32.
    BATCH, SEQ, INPUT_SIZE, NUM_HEADS, HEAD_SIZE = 2, 8, 32, 4, 8
    OUTPUT_DIM = NUM_HEADS * HEAD_SIZE

    key = jax.random.PRNGKey(0)
    kx, kq, kk, kv = jax.random.split(key, 4)

    x = jax.random.normal(kx, (BATCH, SEQ, INPUT_SIZE), dtype=jnp.float32)
    w_scale = 1.0 / math.sqrt(INPUT_SIZE)
    wq = jax.random.normal(kq, (INPUT_SIZE, OUTPUT_DIM), dtype=jnp.float32) * w_scale
    wk = jax.random.normal(kk, (INPUT_SIZE, OUTPUT_DIM), dtype=jnp.float32) * w_scale
    wv = jax.random.normal(kv, (INPUT_SIZE, OUTPUT_DIM), dtype=jnp.float32) * w_scale

    # Key-padding: batch 0 attends to all 8 keys, batch 1 only to the first 6.
    valid_len = jnp.array([8, 6], dtype=jnp.int32)

    ref = multi_head_attention_reference(
        x, wq, wk, wv, valid_len, num_heads=NUM_HEADS, head_size=HEAD_SIZE)

    # 1) f32 MXU-operand path: tight structural check against the reference.
    out_f32 = multi_head_attention_forward(
        x, wq, wk, wv, valid_len, num_heads=NUM_HEADS, head_size=HEAD_SIZE,
        mxu_dtype=jnp.float32)
    out_f32 = jax.block_until_ready(out_f32)
    assert out_f32.shape == (BATCH, SEQ, OUTPUT_DIM), out_f32.shape
    assert jnp.allclose(out_f32, ref, atol=1e-2, rtol=1e-2), (
        "f32-path mismatch vs reference: max abs diff = "
        f"{float(jnp.max(jnp.abs(out_f32 - ref)))}")

    # 2) bf16 MXU-operand path (default; v6e/v7x MXU throughput), f32 softmax,
    #    checked with a tolerance appropriate for bf16 matmul inputs.
    out_bf16 = multi_head_attention_forward(
        x, wq, wk, wv, valid_len, num_heads=NUM_HEADS, head_size=HEAD_SIZE,
        mxu_dtype=jnp.bfloat16)
    out_bf16 = jax.block_until_ready(out_bf16)
    assert out_bf16.shape == (BATCH, SEQ, OUTPUT_DIM), out_bf16.shape
    assert jnp.allclose(out_bf16, ref, atol=5e-2, rtol=5e-2), (
        "bf16-path mismatch vs reference: max abs diff = "
        f"{float(jnp.max(jnp.abs(out_bf16 - ref)))}")

    print("KERNEL_OK")
</pallas_src>

<mosaic_0001>
module attributes {stable_mosaic.version = 11 : i64} {
  func.func @_mha_kernel(%arg0: i32, %arg1: memref<2xi32, #tpu.memory_space<smem>>, %arg2: memref<2x8x32xf32, #tpu.memory_space<vmem>>, %arg3: memref<32x96xf32, #tpu.memory_space<vmem>>, %arg4: memref<2x8x32xf32, #tpu.memory_space<vmem>>, %arg5: memref<2x8x32xf32, #tpu.memory_space<vmem>>) attributes {dimension_semantics = [#tpu.dimension_semantics<parallel>], iteration_bounds = array<i64: 1>, scalar_prefetch = 1 : i64, scratch_operands = 1 : i64, tpu.core_type = #tpu.core_type<tc>, window_params = [{transform_indices = @transform_0, window_bounds = array<i64: 2, 8, 32>}, {pipeline_mode = #tpu.pipeline_mode<synchronous>, transform_indices = @transform_1, window_bounds = array<i64: 32, 96>}, {transform_indices = @transform_2, window_bounds = array<i64: 2, 8, 32>}]} {
    %c0 = arith.constant 0 : index
    %c0_0 = arith.constant 0 : index
    %c0_1 = arith.constant 0 : index
    %0 = vector.load %arg2[%c0, %c0_0, %c0_1] : memref<2x8x32xf32, #tpu.memory_space<vmem>>, vector<2x8x32xf32>
    %c0_2 = arith.constant 0 : index
    %c0_3 = arith.constant 0 : index
    %1 = vector.load %arg3[%c0_2, %c0_3] : memref<32x96xf32, #tpu.memory_space<vmem>>, vector<32x96xf32>
    %2 = vector.shape_cast %0 : vector<2x8x32xf32> to vector<16x32xf32>
    %cst = arith.constant dense<0.000000e+00> : vector<16x96xf32>
    %3 = tpu.matmul %2, %1, %cst {dimension_numbers = #tpu.dot_dimension_numbers<[1], [0], [0], [1], [0, 0, 1, 1], [], []>} : vector<16x32xf32>, vector<32x96xf32>, vector<16x96xf32> -> vector<16x96xf32>
    %4 = vector.shape_cast %3 : vector<16x96xf32> to vector<2x8x96xf32>
    %5 = vector.extract_strided_slice %4 {offsets = [0, 0, 0], sizes = [2, 8, 32], strides = [1, 1, 1]} : vector<2x8x96xf32> to vector<2x8x32xf32>
    %cst_4 = arith.constant 0.353553385 : f32
    %6 = vector.broadcast %cst_4 : f32 to vector<2x8x32xf32>
    %7 = arith.mulf %5, %6 : vector<2x8x32xf32>
    %8 = vector.extract_strided_slice %4 {offsets = [0, 0, 32], sizes = [2, 8, 32], strides = [1, 1, 1]} : vector<2x8x96xf32> to vector<2x8x32xf32>
    %9 = vector.extract_strided_slice %4 {offsets = [0, 0, 64], sizes = [2, 8, 32], strides = [1, 1, 1]} : vector<2x8x96xf32> to vector<2x8x32xf32>
    %c2_i32 = arith.constant 2 : i32
    %10 = arith.muli %arg0, %c2_i32 : i32
    %11 = tpu.iota {dimensions = array<i32: 1>} : vector<1x8xi32>
    %c0_i32 = arith.constant 0 : i32
    %12 = arith.addi %10, %c0_i32 : i32
    %13 = arith.index_cast %12 : i32 to index
    %14 = memref.load %arg1[%13] : memref<2xi32, #tpu.memory_space<smem>>
    %15 = vector.broadcast %14 : i32 to vector<1x8xi32>
    %16 = arith.cmpi sge, %11, %15 : vector<1x8xi32>
    %cst_5 = arith.constant -1.000000e+09 : f32
    %cst_6 = arith.constant 0.000000e+00 : f32
    %17 = vector.broadcast %cst_5 : f32 to vector<1x8xf32>
    %18 = vector.broadcast %cst_6 : f32 to vector<1x8xf32>
    %19 = arith.select %16, %17, %18 : vector<1x8xi1>, vector<1x8xf32>
    %c1_i32 = arith.constant 1 : i32
    %20 = arith.addi %10, %c1_i32 : i32
    %21 = arith.index_cast %20 : i32 to index
    %22 = memref.load %arg1[%21] : memref<2xi32, #tpu.memory_space<smem>>
    %23 = vector.broadcast %22 : i32 to vector<1x8xi32>
    %24 = arith.cmpi sge, %11, %23 : vector<1x8xi32>
    %cst_7 = arith.constant -1.000000e+09 : f32
    %cst_8 = arith.constant 0.000000e+00 : f32
    %25 = vector.broadcast %cst_7 : f32 to vector<1x8xf32>
    %26 = vector.broadcast %cst_8 : f32 to vector<1x8xf32>
    %27 = arith.select %24, %25, %26 : vector<1x8xi1>, vector<1x8xf32>
    %28 = tpu.concatenate %19, %27 in 0 : vector<1x8xf32>, vector<1x8xf32> -> vector<2x8xf32>
    %29 = vector.shape_cast %28 : vector<2x8xf32> to vector<2x1x8xf32>
    %30 = vector.extract_strided_slice %7 {offsets = [0, 0, 0], sizes = [2, 8, 8], strides = [1, 1, 1]} : vector<2x8x32xf32> to vector<2x8x8xf32>
    %31 = vector.extract_strided_slice %8 {offsets = [0, 0, 0], sizes = [2, 8, 8], strides = [1, 1, 1]} : vector<2x8x32xf32> to vector<2x8x8xf32>
    %32 = vector.extract_strided_slice %9 {offsets = [0, 0, 0], sizes = [2, 8, 8], strides = [1, 1, 1]} : vector<2x8x32xf32> to vector<2x8x8xf32>
    "tpu.trace_start"() <{level = 10 : i32, message = "bqd,bkd->bqk"}> : () -> ()
    %cst_9 = arith.constant dense<0.000000e+00> : vector<2x8x8xf32>
    %33 = tpu.matmul %30, %31, %cst_9 {dimension_numbers = #tpu.dot_dimension_numbers<[2], [2], [1], [1], [0, 0, 0, 1, 1, 1], [0], [0]>} : vector<2x8x8xf32>, vector<2x8x8xf32>, vector<2x8x8xf32> -> vector<2x8x8xf32>
    "tpu.trace_stop"() : () -> ()
    %34 = vector.broadcast %29 : vector<2x1x8xf32> to vector<2x8x8xf32>
    %35 = arith.addf %33, %34 : vector<2x8x8xf32>
    %cst_10 = arith.constant dense<0xFF800000> : vector<2x8xf32>
    %36 = vector.multi_reduction <maximumf>, %35, %cst_10 [2] : vector<2x8x8xf32> to vector<2x8xf32>
    %37 = vector.shape_cast %36 : vector<2x8xf32> to vector<2x8x1xf32>
    %38 = vector.broadcast %37 : vector<2x8x1xf32> to vector<2x8x8xf32>
    %39 = arith.subf %35, %38 : vector<2x8x8xf32>
    %40 = math.exp %39 : vector<2x8x8xf32>
    %cst_11 = arith.constant dense<0.000000e+00> : vector<2x8xf32>
    %41 = vector.multi_reduction <add>, %40, %cst_11 [2] : vector<2x8x8xf32> to vector<2x8xf32>
    %42 = vector.shape_cast %41 : vector<2x8xf32> to vector<2x8x1xf32>
    "tpu.trace_start"() <{level = 10 : i32, message = "bqk,bkd->bqd"}> : () -> ()
    %cst_12 = arith.constant dense<0.000000e+00> : vector<2x8x8xf32>
    %43 = tpu.matmul %40, %32, %cst_12 {dimension_numbers = #tpu.dot_dimension_numbers<[2], [1], [1], [2], [0, 0, 0, 1, 1, 2], [0], [0]>} : vector<2x8x8xf32>, vector<2x8x8xf32>, vector<2x8x8xf32> -> vector<2x8x8xf32>
    "tpu.trace_stop"() : () -> ()
    %44 = tpu.reciprocal %42 {approx = true} : vector<2x8x1xf32> -> vector<2x8x1xf32>
    %45 = vector.broadcast %44 : vector<2x8x1xf32> to vector<2x8x8xf32>
    %46 = arith.mulf %43, %45 : vector<2x8x8xf32>
    %c0_13 = arith.constant 0 : index
    %c0_14 = arith.constant 0 : index
    %c0_15 = arith.constant 0 : index
    %47 = vector.load %arg5[%c0_13, %c0_14, %c0_15] : memref<2x8x32xf32, #tpu.memory_space<vmem>>, vector<2x8x8xf32>
    tpu.vector_store %arg5[%c0_13, %c0_14, %c0_15], %46 {strides = array<i32>} : memref<2x8x32xf32, #tpu.memory_space<vmem>>, vector<2x8x8xf32>,
    %48 = vector.extract_strided_slice %7 {offsets = [0, 0, 8], sizes = [2, 8, 8], strides = [1, 1, 1]} : vector<2x8x32xf32> to vector<2x8x8xf32>
    %49 = vector.extract_strided_slice %8 {offsets = [0, 0, 8], sizes = [2, 8, 8], strides = [1, 1, 1]} : vector<2x8x32xf32> to vector<2x8x8xf32>
    %50 = vector.extract_strided_slice %9 {offsets = [0, 0, 8], sizes = [2, 8, 8], strides = [1, 1, 1]} : vector<2x8x32xf32> to vector<2x8x8xf32>
    "tpu.trace_start"() <{level = 10 : i32, message = "bqd,bkd->bqk"}> : () -> ()
    %cst_16 = arith.constant dense<0.000000e+00> : vector<2x8x8xf32>
    %51 = tpu.matmul %48, %49, %cst_16 {dimension_numbers = #tpu.dot_dimension_numbers<[2], [2], [1], [1], [0, 0, 0, 1, 1, 1], [0], [0]>} : vector<2x8x8xf32>, vector<2x8x8xf32>, vector<2x8x8xf32> -> vector<2x8x8xf32>
    "tpu.trace_stop"() : () -> ()
    %52 = vector.broadcast %29 : vector<2x1x8xf32> to vector<2x8x8xf32>
    %53 = arith.addf %51, %52 : vector<2x8x8xf32>
    %cst_17 = arith.constant dense<0xFF800000> : vector<2x8xf32>
    %54 = vector.multi_reduction <maximumf>, %53, %cst_17 [2] : vector<2x8x8xf32> to vector<2x8xf32>
    %55 = vector.shape_cast %54 : vector<2x8xf32> to vector<2x8x1xf32>
    %56 = vector.broadcast %55 : vector<2x8x1xf32> to vector<2x8x8xf32>
    %57 = arith.subf %53, %56 : vector<2x8x8xf32>
    %58 = math.exp %57 : vector<2x8x8xf32>
    %cst_18 = arith.constant dense<0.000000e+00> : vector<2x8xf32>
    %59 = vector.multi_reduction <add>, %58, %cst_18 [2] : vector<2x8x8xf32> to vector<2x8xf32>
    %60 = vector.shape_cast %59 : vector<2x8xf32> to vector<2x8x1xf32>
    "tpu.trace_start"() <{level = 10 : i32, message = "bqk,bkd->bqd"}> : () -> ()
    %cst_19 = arith.constant dense<0.000000e+00> : vector<2x8x8xf32>
    %61 = tpu.matmul %58, %50, %cst_19 {dimension_numbers = #tpu.dot_dimension_numbers<[2], [1], [1], [2], [0, 0, 0, 1, 1, 2], [0], [0]>} : vector<2x8x8xf32>, vector<2x8x8xf32>, vector<2x8x8xf32> -> vector<2x8x8xf32>
    "tpu.trace_stop"() : () -> ()
    %62 = tpu.reciprocal %60 {approx = true} : vector<2x8x1xf32> -> vector<2x8x1xf32>
    %63 = vector.broadcast %62 : vector<2x8x1xf32> to vector<2x8x8xf32>
    %64 = arith.mulf %61, %63 : vector<2x8x8xf32>
    %c0_20 = arith.constant 0 : index
    %c0_21 = arith.constant 0 : index
    %c8 = arith.constant 8 : index
    %65 = vector.load %arg5[%c0_20, %c0_21, %c8] : memref<2x8x32xf32, #tpu.memory_space<vmem>>, vector<2x8x8xf32>
    tpu.vector_store %arg5[%c0_20, %c0_21, %c8], %64 {strides = array<i32>} : memref<2x8x32xf32, #tpu.memory_space<vmem>>, vector<2x8x8xf32>,
    %66 = vector.extract_strided_slice %7 {offsets = [0, 0, 16], sizes = [2, 8, 8], strides = [1, 1, 1]} : vector<2x8x32xf32> to vector<2x8x8xf32>
    %67 = vector.extract_strided_slice %8 {offsets = [0, 0, 16], sizes = [2, 8, 8], strides = [1, 1, 1]} : vector<2x8x32xf32> to vector<2x8x8xf32>
    %68 = vector.extract_strided_slice %9 {offsets = [0, 0, 16], sizes = [2, 8, 8], strides = [1, 1, 1]} : vector<2x8x32xf32> to vector<2x8x8xf32>
    "tpu.trace_start"() <{level = 10 : i32, message = "bqd,bkd->bqk"}> : () -> ()
    %cst_22 = arith.constant dense<0.000000e+00> : vector<2x8x8xf32>
    %69 = tpu.matmul %66, %67, %cst_22 {dimension_numbers = #tpu.dot_dimension_numbers<[2], [2], [1], [1], [0, 0, 0, 1, 1, 1], [0], [0]>} : vector<2x8x8xf32>, vector<2x8x8xf32>, vector<2x8x8xf32> -> vector<2x8x8xf32>
    "tpu.trace_stop"() : () -> ()
    %70 = vector.broadcast %29 : vector<2x1x8xf32> to vector<2x8x8xf32>
    %71 = arith.addf %69, %70 : vector<2x8x8xf32>
    %cst_23 = arith.constant dense<0xFF800000> : vector<2x8xf32>
    %72 = vector.multi_reduction <maximumf>, %71, %cst_23 [2] : vector<2x8x8xf32> to vector<2x8xf32>
    %73 = vector.shape_cast %72 : vector<2x8xf32> to vector<2x8x1xf32>
    %74 = vector.broadcast %73 : vector<2x8x1xf32> to vector<2x8x8xf32>
    %75 = arith.subf %71, %74 : vector<2x8x8xf32>
    %76 = math.exp %75 : vector<2x8x8xf32>
    %cst_24 = arith.constant dense<0.000000e+00> : vector<2x8xf32>
    %77 = vector.multi_reduction <add>, %76, %cst_24 [2] : vector<2x8x8xf32> to vector<2x8xf32>
    %78 = vector.shape_cast %77 : vector<2x8xf32> to vector<2x8x1xf32>
    "tpu.trace_start"() <{level = 10 : i32, message = "bqk,bkd->bqd"}> : () -> ()
    %cst_25 = arith.constant dense<0.000000e+00> : vector<2x8x8xf32>
    %79 = tpu.matmul %76, %68, %cst_25 {dimension_numbers = #tpu.dot_dimension_numbers<[2], [1], [1], [2], [0, 0, 0, 1, 1, 2], [0], [0]>} : vector<2x8x8xf32>, vector<2x8x8xf32>, vector<2x8x8xf32> -> vector<2x8x8xf32>
    "tpu.trace_stop"() : () -> ()
    %80 = tpu.reciprocal %78 {approx = true} : vector<2x8x1xf32> -> vector<2x8x1xf32>
    %81 = vector.broadcast %80 : vector<2x8x1xf32> to vector<2x8x8xf32>
    %82 = arith.mulf %79, %81 : vector<2x8x8xf32>
    %c0_26 = arith.constant 0 : index
    %c0_27 = arith.constant 0 : index
    %c16 = arith.constant 16 : index
    %83 = vector.load %arg5[%c0_26, %c0_27, %c16] : memref<2x8x32xf32, #tpu.memory_space<vmem>>, vector<2x8x8xf32>
    tpu.vector_store %arg5[%c0_26, %c0_27, %c16], %82 {strides = array<i32>} : memref<2x8x32xf32, #tpu.memory_space<vmem>>, vector<2x8x8xf32>,
    %84 = vector.extract_strided_slice %7 {offsets = [0, 0, 24], sizes = [2, 8, 8], strides = [1, 1, 1]} : vector<2x8x32xf32> to vector<2x8x8xf32>
    %85 = vector.extract_strided_slice %8 {offsets = [0, 0, 24], sizes = [2, 8, 8], strides = [1, 1, 1]} : vector<2x8x32xf32> to vector<2x8x8xf32>
    %86 = vector.extract_strided_slice %9 {offsets = [0, 0, 24], sizes = [2, 8, 8], strides = [1, 1, 1]} : vector<2x8x32xf32> to vector<2x8x8xf32>
    "tpu.trace_start"() <{level = 10 : i32, message = "bqd,bkd->bqk"}> : () -> ()
    %cst_28 = arith.constant dense<0.000000e+00> : vector<2x8x8xf32>
    %87 = tpu.matmul %84, %85, %cst_28 {dimension_numbers = #tpu.dot_dimension_numbers<[2], [2], [1], [1], [0, 0, 0, 1, 1, 1], [0], [0]>} : vector<2x8x8xf32>, vector<2x8x8xf32>, vector<2x8x8xf32> -> vector<2x8x8xf32>
    "tpu.trace_stop"() : () -> ()
    %88 = vector.broadcast %29 : vector<2x1x8xf32> to vector<2x8x8xf32>
    %89 = arith.addf %87, %88 : vector<2x8x8xf32>
    %cst_29 = arith.constant dense<0xFF800000> : vector<2x8xf32>
    %90 = vector.multi_reduction <maximumf>, %89, %cst_29 [2] : vector<2x8x8xf32> to vector<2x8xf32>
    %91 = vector.shape_cast %90 : vector<2x8xf32> to vector<2x8x1xf32>
    %92 = vector.broadcast %91 : vector<2x8x1xf32> to vector<2x8x8xf32>
    %93 = arith.subf %89, %92 : vector<2x8x8xf32>
    %94 = math.exp %93 : vector<2x8x8xf32>
    %cst_30 = arith.constant dense<0.000000e+00> : vector<2x8xf32>
    %95 = vector.multi_reduction <add>, %94, %cst_30 [2] : vector<2x8x8xf32> to vector<2x8xf32>
    %96 = vector.shape_cast %95 : vector<2x8xf32> to vector<2x8x1xf32>
    "tpu.trace_start"() <{level = 10 : i32, message = "bqk,bkd->bqd"}> : () -> ()
    %cst_31 = arith.constant dense<0.000000e+00> : vector<2x8x8xf32>
    %97 = tpu.matmul %94, %86, %cst_31 {dimension_numbers = #tpu.dot_dimension_numbers<[2], [1], [1], [2], [0, 0, 0, 1, 1, 2], [0], [0]>} : vector<2x8x8xf32>, vector<2x8x8xf32>, vector<2x8x8xf32> -> vector<2x8x8xf32>
    "tpu.trace_stop"() : () -> ()
    %98 = tpu.reciprocal %96 {approx = true} : vector<2x8x1xf32> -> vector<2x8x1xf32>
    %99 = vector.broadcast %98 : vector<2x8x1xf32> to vector<2x8x8xf32>
    %100 = arith.mulf %97, %99 : vector<2x8x8xf32>
    %c0_32 = arith.constant 0 : index
    %c0_33 = arith.constant 0 : index
    %c24 = arith.constant 24 : index
    %101 = vector.load %arg5[%c0_32, %c0_33, %c24] : memref<2x8x32xf32, #tpu.memory_space<vmem>>, vector<2x8x8xf32>
    tpu.vector_store %arg5[%c0_32, %c0_33, %c24], %100 {strides = array<i32>} : memref<2x8x32xf32, #tpu.memory_space<vmem>>, vector<2x8x8xf32>,
    %c0_34 = arith.constant 0 : index
    %c0_35 = arith.constant 0 : index
    %c0_36 = arith.constant 0 : index
    %102 = vector.load %arg5[%c0_34, %c0_35, %c0_36] : memref<2x8x32xf32, #tpu.memory_space<vmem>>, vector<2x8x32xf32>
    %c0_37 = arith.constant 0 : index
    %c0_38 = arith.constant 0 : index
    %c0_39 = arith.constant 0 : index
    %103 = vector.load %arg4[%c0_37, %c0_38, %c0_39] : memref<2x8x32xf32, #tpu.memory_space<vmem>>, vector<2x8x32xf32>
    tpu.vector_store %arg4[%c0_37, %c0_38, %c0_39], %102 {strides = array<i32>} : memref<2x8x32xf32, #tpu.memory_space<vmem>>, vector<2x8x32xf32>,
    return
  }
  func.func @transform_0(%arg0: i32, %arg1: memref<2xi32, #tpu.memory_space<smem>>) -> (i32, i32, i32) {
    %c0_i32 = arith.constant 0 : i32
    %c0_i32_0 = arith.constant 0 : i32
    %c0_i32_1 = arith.constant 0 : i32
    return %arg0, %c0_i32, %c0_i32_0 : i32, i32, i32
  }
  func.func @transform_1(%arg0: i32, %arg1: memref<2xi32, #tpu.memory_space<smem>>) -> (i32, i32) {
    %c0_i32 = arith.constant 0 : i32
    %c0_i32_0 = arith.constant 0 : i32
    %c0_i32_1 = arith.constant 0 : i32
    return %c0_i32, %c0_i32_0 : i32, i32
  }
  func.func @transform_2(%arg0: i32, %arg1: memref<2xi32, #tpu.memory_space<smem>>) -> (i32, i32, i32) {
    %c0_i32 = arith.constant 0 : i32
    %c0_i32_0 = arith.constant 0 : i32
    %c0_i32_1 = arith.constant 0 : i32
    return %arg0, %c0_i32, %c0_i32_0 : i32, i32, i32
  }
}

module attributes {stable_mosaic.version = 11 : i64} {
  func.func @_mha_kernel(%arg0: i32, %arg1: memref<2xi32, #tpu.memory_space<smem>>, %arg2: memref<2x8x32xf32, #tpu.memory_space<vmem>>, %arg3: memref<32x96xf32, #tpu.memory_space<vmem>>, %arg4: memref<2x8x32xf32, #tpu.memory_space<vmem>>, %arg5: memref<2x8x32xf32, #tpu.memory_space<vmem>>) attributes {dimension_semantics = [#tpu.dimension_semantics<parallel>], iteration_bounds = array<i64: 1>, scalar_prefetch = 1 : i64, scratch_operands = 1 : i64, tpu.core_type = #tpu.core_type<tc>, window_params = [{transform_indices = @transform_0, window_bounds = array<i64: 2, 8, 32>}, {pipeline_mode = #tpu.pipeline_mode<synchronous>, transform_indices = @transform_1, window_bounds = array<i64: 32, 96>}, {transform_indices = @transform_2, window_bounds = array<i64: 2, 8, 32>}]} {
    %c0 = arith.constant 0 : index
    %c0_0 = arith.constant 0 : index
    %c0_1 = arith.constant 0 : index
    %0 = vector.load %arg2[%c0, %c0_0, %c0_1] : memref<2x8x32xf32, #tpu.memory_space<vmem>>, vector<2x8x32xf32>
    %c0_2 = arith.constant 0 : index
    %c0_3 = arith.constant 0 : index
    %1 = vector.load %arg3[%c0_2, %c0_3] : memref<32x96xf32, #tpu.memory_space<vmem>>, vector<32x96xf32>
    %2 = vector.shape_cast %0 : vector<2x8x32xf32> to vector<16x32xf32>
    %cst = arith.constant dense<0.000000e+00> : vector<16x96xf32>
    %3 = tpu.matmul %2, %1, %cst {dimension_numbers = #tpu.dot_dimension_numbers<[1], [0], [0], [1], [0, 0, 1, 1], [], []>} : vector<16x32xf32>, vector<32x96xf32>, vector<16x96xf32> -> vector<16x96xf32>
    %4 = vector.shape_cast %3 : vector<16x96xf32> to vector<2x8x96xf32>
    %5 = vector.extract_strided_slice %4 {offsets = [0, 0, 0], sizes = [2, 8, 32], strides = [1, 1, 1]} : vector<2x8x96xf32> to vector<2x8x32xf32>
    %cst_4 = arith.constant 0.353553385 : f32
    %6 = vector.broadcast %cst_4 : f32 to vector<2x8x32xf32>
    %7 = arith.mulf %5, %6 : vector<2x8x32xf32>
    %8 = vector.extract_strided_slice %4 {offsets = [0, 0, 32], sizes = [2, 8, 32], strides = [1, 1, 1]} : vector<2x8x96xf32> to vector<2x8x32xf32>
    %9 = vector.extract_strided_slice %4 {offsets = [0, 0, 64], sizes = [2, 8, 32], strides = [1, 1, 1]} : vector<2x8x96xf32> to vector<2x8x32xf32>
    %c2_i32 = arith.constant 2 : i32
    %10 = arith.muli %arg0, %c2_i32 : i32
    %11 = tpu.iota {dimensions = array<i32: 1>} : vector<1x8xi32>
    %c0_i32 = arith.constant 0 : i32
    %12 = arith.addi %10, %c0_i32 : i32
    %13 = arith.index_cast %12 : i32 to index
    %14 = memref.load %arg1[%13] : memref<2xi32, #tpu.memory_space<smem>>
    %15 = vector.broadcast %14 : i32 to vector<1x8xi32>
    %16 = arith.cmpi sge, %11, %15 : vector<1x8xi32>
    %cst_5 = arith.constant -1.000000e+09 : f32
    %cst_6 = arith.constant 0.000000e+00 : f32
    %17 = vector.broadcast %cst_5 : f32 to vector<1x8xf32>
    %18 = vector.broadcast %cst_6 : f32 to vector<1x8xf32>
    %19 = arith.select %16, %17, %18 : vector<1x8xi1>, vector<1x8xf32>
    %c1_i32 = arith.constant 1 : i32
    %20 = arith.addi %10, %c1_i32 : i32
    %21 = arith.index_cast %20 : i32 to index
    %22 = memref.load %arg1[%21] : memref<2xi32, #tpu.memory_space<smem>>
    %23 = vector.broadcast %22 : i32 to vector<1x8xi32>
    %24 = arith.cmpi sge, %11, %23 : vector<1x8xi32>
    %cst_7 = arith.constant -1.000000e+09 : f32
    %cst_8 = arith.constant 0.000000e+00 : f32
    %25 = vector.broadcast %cst_7 : f32 to vector<1x8xf32>
    %26 = vector.broadcast %cst_8 : f32 to vector<1x8xf32>
    %27 = arith.select %24, %25, %26 : vector<1x8xi1>, vector<1x8xf32>
    %28 = tpu.concatenate %19, %27 in 0 : vector<1x8xf32>, vector<1x8xf32> -> vector<2x8xf32>
    %29 = vector.shape_cast %28 : vector<2x8xf32> to vector<2x1x8xf32>
    %30 = vector.extract_strided_slice %7 {offsets = [0, 0, 0], sizes = [2, 8, 8], strides = [1, 1, 1]} : vector<2x8x32xf32> to vector<2x8x8xf32>
    %31 = vector.extract_strided_slice %8 {offsets = [0, 0, 0], sizes = [2, 8, 8], strides = [1, 1, 1]} : vector<2x8x32xf32> to vector<2x8x8xf32>
    %32 = vector.extract_strided_slice %9 {offsets = [0, 0, 0], sizes = [2, 8, 8], strides = [1, 1, 1]} : vector<2x8x32xf32> to vector<2x8x8xf32>
    "tpu.trace_start"() <{level = 10 : i32, message = "bqd,bkd->bqk"}> : () -> ()
    %cst_9 = arith.constant dense<0.000000e+00> : vector<2x8x8xf32>
    %33 = tpu.matmul %30, %31, %cst_9 {dimension_numbers = #tpu.dot_dimension_numbers<[2], [2], [1], [1], [0, 0, 0, 1, 1, 1], [0], [0]>} : vector<2x8x8xf32>, vector<2x8x8xf32>, vector<2x8x8xf32> -> vector<2x8x8xf32>
    "tpu.trace_stop"() : () -> ()
    %34 = vector.broadcast %29 : vector<2x1x8xf32> to vector<2x8x8xf32>
    %35 = arith.addf %33, %34 : vector<2x8x8xf32>
    %cst_10 = arith.constant dense<0xFF800000> : vector<2x8xf32>
    %36 = vector.multi_reduction <maximumf>, %35, %cst_10 [2] : vector<2x8x8xf32> to vector<2x8xf32>
    %37 = vector.shape_cast %36 : vector<2x8xf32> to vector<2x8x1xf32>
    %38 = vector.broadcast %37 : vector<2x8x1xf32> to vector<2x8x8xf32>
    %39 = arith.subf %35, %38 : vector<2x8x8xf32>
    %40 = math.exp %39 : vector<2x8x8xf32>
    %cst_11 = arith.constant dense<0.000000e+00> : vector<2x8xf32>
    %41 = vector.multi_reduction <add>, %40, %cst_11 [2] : vector<2x8x8xf32> to vector<2x8xf32>
    %42 = vector.shape_cast %41 : vector<2x8xf32> to vector<2x8x1xf32>
    "tpu.trace_start"() <{level = 10 : i32, message = "bqk,bkd->bqd"}> : () -> ()
    %cst_12 = arith.constant dense<0.000000e+00> : vector<2x8x8xf32>
    %43 = tpu.matmul %40, %32, %cst_12 {dimension_numbers = #tpu.dot_dimension_numbers<[2], [1], [1], [2], [0, 0, 0, 1, 1, 2], [0], [0]>} : vector<2x8x8xf32>, vector<2x8x8xf32>, vector<2x8x8xf32> -> vector<2x8x8xf32>
    "tpu.trace_stop"() : () -> ()
    %44 = tpu.reciprocal %42 {approx = true} : vector<2x8x1xf32> -> vector<2x8x1xf32>
    %45 = vector.broadcast %44 : vector<2x8x1xf32> to vector<2x8x8xf32>
    %46 = arith.mulf %43, %45 : vector<2x8x8xf32>
    %c0_13 = arith.constant 0 : index
    %c0_14 = arith.constant 0 : index
    %c0_15 = arith.constant 0 : index
    %47 = vector.load %arg5[%c0_13, %c0_14, %c0_15] : memref<2x8x32xf32, #tpu.memory_space<vmem>>, vector<2x8x8xf32>
    tpu.vector_store %arg5[%c0_13, %c0_14, %c0_15], %46 {strides = array<i32>} : memref<2x8x32xf32, #tpu.memory_space<vmem>>, vector<2x8x8xf32>,
    %48 = vector.extract_strided_slice %7 {offsets = [0, 0, 8], sizes = [2, 8, 8], strides = [1, 1, 1]} : vector<2x8x32xf32> to vector<2x8x8xf32>
    %49 = vector.extract_strided_slice %8 {offsets = [0, 0, 8], sizes = [2, 8, 8], strides = [1, 1, 1]} : vector<2x8x32xf32> to vector<2x8x8xf32>
    %50 = vector.extract_strided_slice %9 {offsets = [0, 0, 8], sizes = [2, 8, 8], strides = [1, 1, 1]} : vector<2x8x32xf32> to vector<2x8x8xf32>
    "tpu.trace_start"() <{level = 10 : i32, message = "bqd,bkd->bqk"}> : () -> ()
    %cst_16 = arith.constant dense<0.000000e+00> : vector<2x8x8xf32>
    %51 = tpu.matmul %48, %49, %cst_16 {dimension_numbers = #tpu.dot_dimension_numbers<[2], [2], [1], [1], [0, 0, 0, 1, 1, 1], [0], [0]>} : vector<2x8x8xf32>, vector<2x8x8xf32>, vector<2x8x8xf32> -> vector<2x8x8xf32>
    "tpu.trace_stop"() : () -> ()
    %52 = vector.broadcast %29 : vector<2x1x8xf32> to vector<2x8x8xf32>
    %53 = arith.addf %51, %52 : vector<2x8x8xf32>
    %cst_17 = arith.constant dense<0xFF800000> : vector<2x8xf32>
    %54 = vector.multi_reduction <maximumf>, %53, %cst_17 [2] : vector<2x8x8xf32> to vector<2x8xf32>
    %55 = vector.shape_cast %54 : vector<2x8xf32> to vector<2x8x1xf32>
    %56 = vector.broadcast %55 : vector<2x8x1xf32> to vector<2x8x8xf32>
    %57 = arith.subf %53, %56 : vector<2x8x8xf32>
    %58 = math.exp %57 : vector<2x8x8xf32>
    %cst_18 = arith.constant dense<0.000000e+00> : vector<2x8xf32>
    %59 = vector.multi_reduction <add>, %58, %cst_18 [2] : vector<2x8x8xf32> to vector<2x8xf32>
    %60 = vector.shape_cast %59 : vector<2x8xf32> to vector<2x8x1xf32>
    "tpu.trace_start"() <{level = 10 : i32, message = "bqk,bkd->bqd"}> : () -> ()
    %cst_19 = arith.constant dense<0.000000e+00> : vector<2x8x8xf32>
    %61 = tpu.matmul %58, %50, %cst_19 {dimension_numbers = #tpu.dot_dimension_numbers<[2], [1], [1], [2], [0, 0, 0, 1, 1, 2], [0], [0]>} : vector<2x8x8xf32>, vector<2x8x8xf32>, vector<2x8x8xf32> -> vector<2x8x8xf32>
    "tpu.trace_stop"() : () -> ()
    %62 = tpu.reciprocal %60 {approx = true} : vector<2x8x1xf32> -> vector<2x8x1xf32>
    %63 = vector.broadcast %62 : vector<2x8x1xf32> to vector<2x8x8xf32>
    %64 = arith.mulf %61, %63 : vector<2x8x8xf32>
    %c0_20 = arith.constant 0 : index
    %c0_21 = arith.constant 0 : index
    %c8 = arith.constant 8 : index
    %65 = vector.load %arg5[%c0_20, %c0_21, %c8] : memref<2x8x32xf32, #tpu.memory_space<vmem>>, vector<2x8x8xf32>
    tpu.vector_store %arg5[%c0_20, %c0_21, %c8], %64 {strides = array<i32>} : memref<2x8x32xf32, #tpu.memory_space<vmem>>, vector<2x8x8xf32>,
    %66 = vector.extract_strided_slice %7 {offsets = [0, 0, 16], sizes = [2, 8, 8], strides = [1, 1, 1]} : vector<2x8x32xf32> to vector<2x8x8xf32>
    %67 = vector.extract_strided_slice %8 {offsets = [0, 0, 16], sizes = [2, 8, 8], strides = [1, 1, 1]} : vector<2x8x32xf32> to vector<2x8x8xf32>
    %68 = vector.extract_strided_slice %9 {offsets = [0, 0, 16], sizes = [2, 8, 8], strides = [1, 1, 1]} : vector<2x8x32xf32> to vector<2x8x8xf32>
    "tpu.trace_start"() <{level = 10 : i32, message = "bqd,bkd->bqk"}> : () -> ()
    %cst_22 = arith.constant dense<0.000000e+00> : vector<2x8x8xf32>
    %69 = tpu.matmul %66, %67, %cst_22 {dimension_numbers = #tpu.dot_dimension_numbers<[2], [2], [1], [1], [0, 0, 0, 1, 1, 1], [0], [0]>} : vector<2x8x8xf32>, vector<2x8x8xf32>, vector<2x8x8xf32> -> vector<2x8x8xf32>
    "tpu.trace_stop"() : () -> ()
    %70 = vector.broadcast %29 : vector<2x1x8xf32> to vector<2x8x8xf32>
    %71 = arith.addf %69, %70 : vector<2x8x8xf32>
    %cst_23 = arith.constant dense<0xFF800000> : vector<2x8xf32>
    %72 = vector.multi_reduction <maximumf>, %71, %cst_23 [2] : vector<2x8x8xf32> to vector<2x8xf32>
    %73 = vector.shape_cast %72 : vector<2x8xf32> to vector<2x8x1xf32>
    %74 = vector.broadcast %73 : vector<2x8x1xf32> to vector<2x8x8xf32>
    %75 = arith.subf %71, %74 : vector<2x8x8xf32>
    %76 = math.exp %75 : vector<2x8x8xf32>
    %cst_24 = arith.constant dense<0.000000e+00> : vector<2x8xf32>
    %77 = vector.multi_reduction <add>, %76, %cst_24 [2] : vector<2x8x8xf32> to vector<2x8xf32>
    %78 = vector.shape_cast %77 : vector<2x8xf32> to vector<2x8x1xf32>
    "tpu.trace_start"() <{level = 10 : i32, message = "bqk,bkd->bqd"}> : () -> ()
    %cst_25 = arith.constant dense<0.000000e+00> : vector<2x8x8xf32>
    %79 = tpu.matmul %76, %68, %cst_25 {dimension_numbers = #tpu.dot_dimension_numbers<[2], [1], [1], [2], [0, 0, 0, 1, 1, 2], [0], [0]>} : vector<2x8x8xf32>, vector<2x8x8xf32>, vector<2x8x8xf32> -> vector<2x8x8xf32>
    "tpu.trace_stop"() : () -> ()
    %80 = tpu.reciprocal %78 {approx = true} : vector<2x8x1xf32> -> vector<2x8x1xf32>
    %81 = vector.broadcast %80 : vector<2x8x1xf32> to vector<2x8x8xf32>
    %82 = arith.mulf %79, %81 : vector<2x8x8xf32>
    %c0_26 = arith.constant 0 : index
    %c0_27 = arith.constant 0 : index
    %c16 = arith.constant 16 : index
    %83 = vector.load %arg5[%c0_26, %c0_27, %c16] : memref<2x8x32xf32, #tpu.memory_space<vmem>>, vector<2x8x8xf32>
    tpu.vector_store %arg5[%c0_26, %c0_27, %c16], %82 {strides = array<i32>} : memref<2x8x32xf32, #tpu.memory_space<vmem>>, vector<2x8x8xf32>,
    %84 = vector.extract_strided_slice %7 {offsets = [0, 0, 24], sizes = [2, 8, 8], strides = [1, 1, 1]} : vector<2x8x32xf32> to vector<2x8x8xf32>
    %85 = vector.extract_strided_slice %8 {offsets = [0, 0, 24], sizes = [2, 8, 8], strides = [1, 1, 1]} : vector<2x8x32xf32> to vector<2x8x8xf32>
    %86 = vector.extract_strided_slice %9 {offsets = [0, 0, 24], sizes = [2, 8, 8], strides = [1, 1, 1]} : vector<2x8x32xf32> to vector<2x8x8xf32>
    "tpu.trace_start"() <{level = 10 : i32, message = "bqd,bkd->bqk"}> : () -> ()
    %cst_28 = arith.constant dense<0.000000e+00> : vector<2x8x8xf32>
    %87 = tpu.matmul %84, %85, %cst_28 {dimension_numbers = #tpu.dot_dimension_numbers<[2], [2], [1], [1], [0, 0, 0, 1, 1, 1], [0], [0]>} : vector<2x8x8xf32>, vector<2x8x8xf32>, vector<2x8x8xf32> -> vector<2x8x8xf32>
    "tpu.trace_stop"() : () -> ()
    %88 = vector.broadcast %29 : vector<2x1x8xf32> to vector<2x8x8xf32>
    %89 = arith.addf %87, %88 : vector<2x8x8xf32>
    %cst_29 = arith.constant dense<0xFF800000> : vector<2x8xf32>
    %90 = vector.multi_reduction <maximumf>, %89, %cst_29 [2] : vector<2x8x8xf32> to vector<2x8xf32>
    %91 = vector.shape_cast %90 : vector<2x8xf32> to vector<2x8x1xf32>
    %92 = vector.broadcast %91 : vector<2x8x1xf32> to vector<2x8x8xf32>
    %93 = arith.subf %89, %92 : vector<2x8x8xf32>
    %94 = math.exp %93 : vector<2x8x8xf32>
    %cst_30 = arith.constant dense<0.000000e+00> : vector<2x8xf32>
    %95 = vector.multi_reduction <add>, %94, %cst_30 [2] : vector<2x8x8xf32> to vector<2x8xf32>
    %96 = vector.shape_cast %95 : vector<2x8xf32> to vector<2x8x1xf32>
    "tpu.trace_start"() <{level = 10 : i32, message = "bqk,bkd->bqd"}> : () -> ()
    %cst_31 = arith.constant dense<0.000000e+00> : vector<2x8x8xf32>
    %97 = tpu.matmul %94, %86, %cst_31 {dimension_numbers = #tpu.dot_dimension_numbers<[2], [1], [1], [2], [0, 0, 0, 1, 1, 2], [0], [0]>} : vector<2x8x8xf32>, vector<2x8x8xf32>, vector<2x8x8xf32> -> vector<2x8x8xf32>
    "tpu.trace_stop"() : () -> ()
    %98 = tpu.reciprocal %96 {approx = true} : vector<2x8x1xf32> -> vector<2x8x1xf32>
    %99 = vector.broadcast %98 : vector<2x8x1xf32> to vector<2x8x8xf32>
    %100 = arith.mulf %97, %99 : vector<2x8x8xf32>
    %c0_32 = arith.constant 0 : index
    %c0_33 = arith.constant 0 : index
    %c24 = arith.constant 24 : index
    %101 = vector.load %arg5[%c0_32, %c0_33, %c24] : memref<2x8x32xf32, #tpu.memory_space<vmem>>, vector<2x8x8xf32>
    tpu.vector_store %arg5[%c0_32, %c0_33, %c24], %100 {strides = array<i32>} : memref<2x8x32xf32, #tpu.memory_space<vmem>>, vector<2x8x8xf32>,
    %c0_34 = arith.constant 0 : index
    %c0_35 = arith.constant 0 : index
    %c0_36 = arith.constant 0 : index
    %102 = vector.load %arg5[%c0_34, %c0_35, %c0_36] : memref<2x8x32xf32, #tpu.memory_space<vmem>>, vector<2x8x32xf32>
    %c0_37 = arith.constant 0 : index
    %c0_38 = arith.constant 0 : index
    %c0_39 = arith.constant 0 : index
    %103 = vector.load %arg4[%c0_37, %c0_38, %c0_39] : memref<2x8x32xf32, #tpu.memory_space<vmem>>, vector<2x8x32xf32>
    tpu.vector_store %arg4[%c0_37, %c0_38, %c0_39], %102 {strides = array<i32>} : memref<2x8x32xf32, #tpu.memory_space<vmem>>, vector<2x8x32xf32>,
    return
  }
  func.func @transform_0(%arg0: i32, %arg1: memref<2xi32, #tpu.memory_space<smem>>) -> (i32, i32, i32) {
    %c0_i32 = arith.constant 0 : i32
    %c0_i32_0 = arith.constant 0 : i32
    %c0_i32_1 = arith.constant 0 : i32
    return %arg0, %c0_i32, %c0_i32_0 : i32, i32, i32
  }
  func.func @transform_1(%arg0: i32, %arg1: memref<2xi32, #tpu.memory_space<smem>>) -> (i32, i32) {
    %c0_i32 = arith.constant 0 : i32
    %c0_i32_0 = arith.constant 0 : i32
    %c0_i32_1 = arith.constant 0 : i32
    return %c0_i32, %c0_i32_0 : i32, i32
  }
  func.func @transform_2(%arg0: i32, %arg1: memref<2xi32, #tpu.memory_space<smem>>) -> (i32, i32, i32) {
    %c0_i32 = arith.constant 0 : i32
    %c0_i32_0 = arith.constant 0 : i32
    %c0_i32_1 = arith.constant 0 : i32
    return %arg0, %c0_i32, %c0_i32_0 : i32, i32, i32
  }
}

</mosaic_0001>

<bundles_post_ra>
// kernel: tpu_custom_call.1
= control target key start
LH: loop header
LB: loop body
LE: loop exit
PB: predicated region body
PF: predicated region fallthrough
CT: control target
= control target key end

     0   :  { %s877_s15 = smov [#allocation4]   ;;  %s1013_s0 = inlined_call_operand.hbm [shape: s32[2], index: 0, kind: input, shape index: {}]   ;;  %s1014_s1 = inlined_call_operand.hbm [shape: f32[2,8,32], index: 1, kind: input, shape index: {}]   ;;  %s1015_s2 = inlined_call_operand.hbm [shape: f32[32,96], index: 2, kind: input, shape index: {}]   ;;  %s1016_s3 = inlined_call_operand.hbm [shape: f32[2,8,32], index: 3, kind: output, shape index: {}]  }
   0x1   :  { %s9_s14 = sshll.u32 %s1013_s0, 4  ;;  %s10_s14 = int_to_ptr.hbm [resolvable:$true] %s9_s14 }
   0x2   :  { %12 = dma.hbm_to_smem %s10_s14, 16, %s877_s15, [#allocation3] }
   0x3   :  { %869 = dma.done.wait [#allocation3], 16 }
   0x4   :  { %870 = vsyncadd [#allocation3], 4294967280 }
   0x5   :  { %15 = sfence }
   0x6   :  { %16 = vsyncpa [#allocation6], 0 }
   0x7   :  { %17 = vsyncpa [#allocation9], 0 }
   0x8   :  { %18 = vsyncpa [#allocation7], 0  ;;  %s23_s18 = sshll.u32 %s1014_s1, 4  ;;  %s878_s19 = smov [#allocation5]   ;;  %s24_s18 = int_to_ptr.hbm [resolvable:$true] %s23_s18 }
   0x9   :  { %s25_s20 = sshll.u32 %s878_s19, 4  ;;  %s36_s0 = sshll.u32 %s1015_s2, 4  ;;  %s26_s20 = int_to_ptr.vmem [resolvable:$true] %s25_s20  ;;  %s37_s0 = int_to_ptr.hbm [resolvable:$true] %s36_s0 }
   0xa   :  { %s879_s23 = smov 128   ;;  %s880_s24 = smov 8  }
   0xb   :  { %31 = dma.hbm_to_vmem [thread:$0]  %s24_s18, 256, %s26_s20, [#allocation6], %s879_s23, %s879_s23, %s880_s24  }
   0xc   :  { %s881_s25 = smov [#allocation8]  }
   0xd   :  { %s38_s26 = sshll.u32 %s881_s25, 4  ;;  %s39_s26 = int_to_ptr.vmem [resolvable:$true] %s38_s26 }
   0xe   :  { %44 = dma.hbm_to_vmem [thread:$0]  %s37_s0, 512, %s39_s26, [#allocation9], %s879_s23, %s879_s23, %s880_s24  }
   0xf   :  { %871 = dma.done.wait [#allocation6], 256  }
  0x10   :  { %872 = vsyncadd [#allocation6], 4294967040 }
  0x11   :  { %873 = dma.done.wait [#allocation9], 512  }
  0x12   :  { %874 = vsyncadd [#allocation9], 4294966784  ;;  %v58_v0 = vld [vmem:[#allocation8 + $0x18] sm:$0xff]  ;;  %v57_v1 = vld [vmem:[#allocation8 + $0x10] sm:$0xff]  ;;  %vm59_vm0 = vcmask 261120   ;;  %s882_s1 = smov 88   ;;  %v92_v30 = vlaneseq }
  0x13   :  { %78 = vmatpush.msra.mxu0 %v58_v0  ;;  %v56_v2 = vld [vmem:[#allocation8 + $0x8] sm:$0xff]  ;;  %v55_v3 = vld [vmem:[#allocation8] sm:$0xff]  ;;  %v53_v4 = vld [vmem:[#allocation5] sm:$0xff]  ;;  %s883_s2 = smov 96   ;;  %s884_s27 = smov 80   ;;  %vm114_vm1 = vcmask 64512  }
  0x14   :  { %v54_v5 = vld [vmem:[#allocation5 + $0x8] sm:$0xff]  ;;  %s885_s28 = smov 72   ;;  %s886_s29 = smov 120   ;;  %v93_v31 = vand.u32 127, %v92_v30  ;;  %v891_v34 = vmov 0.0   ;;  %vm103_vm4 = vcmask 1040384  }
  0x15   :  { %79 = vmatpush.msra.mxu0 %v57_v1  ;;  %s887_s30 = smov 112   ;;  %s888_s4 = smov 104   ;;  %vm382_vm5 = vcmask 130112   ;;  %vm523_vm6 = vcmask 195712   ;;  %vm664_vm7 = vcmask 261312  }
  0x16   :  { %s889_s5 = smov 56   ;;  %s890_s6 = smov 64  }
  0x17   :  { %80 = vmatpush.msra.mxu0 %v56_v2  ;;  %s94_s7 = sld [smem:[#allocation4]]  ;;  %s892_s9 = smov 40  }
  0x18   :  { %s693_s8 = sld [smem:[#allocation4 + $0x1]]  ;;  %s893_s10 = smov 48  }
  0x19   :  { %81 = vmatpush.msra.mxu0 %v55_v3  ;;  %s894_s11 = smov 16   ;;  %s895_s12 = smov 24  }
  0x1a   :  { %691 = vmatmul.msk.f32.vlgmr.msra.gmra.mxu0 %vm59_vm0, %v53_v4  ;;  %s896_s13 = smov [#allocation10]   ;;  %s677_s17 = sshll.u32 %s1016_s3, 4  ;;  %s678_s17 = int_to_ptr.hbm [resolvable:$true] %s677_s17 }
  0x1b   :  { %s675_s14 = sshll.u32 %s896_s13, 4  ;;  %s676_s14 = int_to_ptr.vmem [resolvable:$true] %s675_s14 }
  0x1d   :  { %v95_v32 = vstv %s94_s7 }
  0x1e   :  { %v100_v33 = vstv %s693_s8  ;;  %vm96_vm2 = vcmp.ge.s32.totalorder %v93_v31, %v95_v32 }
  0x1f   :  { %vm101_vm3 = vcmp.ge.s32.totalorder %v93_v31, %v100_v33  ;;  %v97_v35 = vsel %vm96_vm2, -1e+09, %v891_v34 }
  0x20   :  { %v102_v36 = vsel %vm101_vm3, -1e+09, %v891_v34 }
  0x21   :  { %v104_v37 = vsel %vm103_vm4, %v97_v35, %v102_v36 }
  0x22   :  { %692 = vmatmul.msk.f32.gmra.mxu0 %vm59_vm0, %v54_v5  ;;  %v107_v38 = vperm.slane %v104_v37, 0  ;;  %v106_v42 = vrot.slane %v104_v37, 1 }
  0x24   :  { %v108_v43 = vperm.slane %v106_v42, 0 }
  0x97   :  { %v934_v6 = vpop.f32.mrf.mxu0 }
  0x98   :  { %246 = vrot.lane.b32.xlu2 %v934_v6, %s882_s1  ;;  %112 = vrot.lane.b32.xlu0 %v934_v6, %s883_s2  ;;  %v89_v9 = vmul.f32 0.35355338, %v934_v6 }
  0x9f   :  { %v938_v7 = vpop.f32.mrf.mxu0 }
  0xa0   :  { %387 = vrot.lane.b32.xlu2 %v934_v6, %s884_s27  ;;  %274 = vrot.lane.b32.xlu1 %v938_v7, %s882_s1  ;;  %v90_v8 = vmul.f32 0.35355338, %v938_v7  ;;  %v950_v10 = vpack.i.bf16 %v938_v7, %v934_v6 }
  0xa1   :  { %141 = vrot.lane.b32.xlu0 %v938_v7, %s883_s2 }
  0xa8   :  { %528 = vrot.lane.b32.xlu2 %v934_v6, %s885_s28  ;;  %272 = vrot.lane.b32.xlu1 %v90_v8, %s886_s29 }
  0xa9   :  { %244 = vrot.lane.b32.xlu0 %v89_v9, %s886_s29 }
  0xb0   :  { %413 = vrot.lane.b32.xlu2 %v90_v8, %s887_s30  ;;  %385 = vrot.lane.b32.xlu1 %v89_v9, %s887_s30 }
  0xb1   :  { %526 = vrot.lane.b32.xlu0 %v89_v9, %s888_s4 }
  0xb8   :  { %415 = vrot.lane.b32.xlu1 %v938_v7, %s884_s27 }
  0xb9   :  { %556 = vrot.lane.b32.xlu0 %v938_v7, %s885_s28 }
  0xc0   :  { %554 = vrot.lane.b32.xlu1 %v90_v8, %s888_s4 }
  0xc1   :  { %744 = vrot.lane.b32.xlu0 %v950_v10, %s889_s5 }
  0xc8   :  { %739 = vrot.lane.b32.xlu1 %v950_v10, %s890_s6 }
  0xf2   :  { %v247_v12 = vpop.permute.xlu2 %246 }
  0xfa   :  { %v388_v15 = vpop.permute.xlu2 %387 }
 0x102   :  { %v529_v18 = vpop.permute.xlu2 %528 }
 0x10a   :  { %v113_v11 = vpop.permute.xlu0 %112  ;;  %v414_v23 = vpop.permute.xlu2 %413 }
 0x10b   :  { %694 = vmatpush.xpose.msk.msra.mxu1 %vm114_vm1, %v113_v11 }
 0x10e   :  { %695 = vmatmul.msk.f32.vlgmr.msra.gmra.mxu1 %vm114_vm1, %v89_v9 }
 0x10f   :  { %700 = vmatpush.xpose.msk.msrb.mxu1 %vm114_vm1, %v247_v12 }
 0x112   :  { %v275_v13 = vpop.permute.xlu1 %274 }
 0x113   :  { %v142_v14 = vpop.permute.xlu0 %141 }
 0x114   :  { %696 = vmatpush.xpose.msk.msra.mxu2 %vm114_vm1, %v142_v14 }
 0x117   :  { %697 = vmatmul.msk.f32.vlgmr.msra.gmra.mxu2 %vm114_vm1, %v90_v8 }
 0x118   :  { %702 = vmatpush.xpose.msk.msrb.mxu2 %vm114_vm1, %v275_v13 }
 0x11a   :  { %v273_v16 = vpop.permute.xlu1 %272 }
 0x11b   :  { %v245_v17 = vpop.permute.xlu0 %244 }
 0x11c   :  { %706 = vmatpush.xpose.msk.msra.mxu2 %vm114_vm1, %v388_v15  ;;  %701 = vmatmul.msk.f32.vlgmr.msrb.gmra.mxu1 %vm114_vm1, %v245_v17 }
 0x11f   :  { %703 = vmatmul.msk.f32.vlgmr.msrb.gmra.mxu2 %vm114_vm1, %v273_v16 }
 0x120   :  { %712 = vmatpush.xpose.msk.msrb.mxu2 %vm114_vm1, %v529_v18 }
 0x122   :  { %v386_v19 = vpop.permute.xlu1 %385 }
 0x123   :  { %v527_v20 = vpop.permute.xlu0 %526 }
 0x127   :  { %707 = vmatmul.msk.f32.vlgmr.msra.gmra.mxu2 %vm114_vm1, %v386_v19 }
 0x12a   :  { %v416_v21 = vpop.permute.xlu1 %415 }
 0x12b   :  { %v557_v22 = vpop.permute.xlu0 %556  ;;  %708 = vmatpush.xpose.msk.msrb.mxu0 %vm114_vm1, %v416_v21 }
 0x12e   :  { %709 = vmatmul.msk.f32.vlgmr.msrb.gmra.mxu0 %vm114_vm1, %v414_v23 }
 0x12f   :  { %714 = vmatpush.xpose.msk.msra.mxu0 %vm114_vm1, %v557_v22  ;;  %713 = vmatmul.msk.f32.vlgmr.msrb.gmra.mxu2 %vm114_vm1, %v527_v20 }
 0x132   :  { %v555_v24 = vpop.permute.xlu1 %554 }
 0x133   :  { %v969_v25 = vpop.permute.xlu0 %744 }
 0x134   :  { %v747_v26 = vunpack.i.h.bf16 %v969_v25  ;;  %v746_v5 = vunpack.i.l.bf16 %v969_v25 }
 0x136   :  { %365 = vmatpush.msra.mxu1 %v747_v26  ;;  %715 = vmatmul.msk.f32.vlgmr.msra.gmra.mxu0 %vm114_vm1, %v555_v24 }
 0x13a   :  { %v740_v27 = vpop.permute.xlu1 %739 }
 0x13b   :  { %v741_v28 = vunpack.i.l.bf16 %v740_v27  ;;  %v742_v29 = vunpack.i.h.bf16 %v740_v27 }
 0x13d   :  { %207 = vmatpush.msra.mxu3 %v741_v28 }
 0x13f   :  { %233 = vmatpush.msrb.mxu3 %v742_v29 }
 0x18b   :  { %v137_v39 = vpop.f32.mrf.mxu1 }
 0x18c   :  { %v138_v40 = vadd.f32 %v137_v39, %v107_v38 }
 0x18e   :  { %v168_v41 = vsel %vm114_vm1, %v138_v40, -inf }
 0x18f   :  { %169 = vmax.xlane.f32.xlu2 %v168_v41 }
 0x199   :  { %v269_v44 = vpop.f32.mrf.mxu1 }
 0x19a   :  { %v270_v45 = vadd.f32 %v269_v44, %v107_v38  ;;  %v165_v46 = vpop.f32.mrf.mxu2 }
 0x19b   :  { %v166_v47 = vadd.f32 %v165_v46, %v108_v43 }
 0x19c   :  { %v300_v48 = vsel %vm114_vm1, %v270_v45, -inf }
 0x19d   :  { %301 = vmax.xlane.f32.xlu1 %v300_v48  ;;  %v171_v49 = vsel %vm114_vm1, %v166_v47, -inf }
 0x19e   :  { %172 = vmax.xlane.f32.xlu0 %v171_v49 }
 0x1a2   :  { %v297_v50 = vpop.f32.mrf.mxu2 }
 0x1a3   :  { %v298_v55 = vadd.f32 %v297_v50, %v108_v43 }
 0x1a5   :  { %v303_v59 = vsel %vm114_vm1, %v298_v55, -inf }
 0x1aa   :  { %v410_v53 = vpop.f32.mrf.mxu2 }
 0x1ab   :  { %v438_v51 = vpop.f32.mrf.mxu0  ;;  %v411_v61 = vadd.f32 %v410_v53, %v107_v38 }
 0x1ac   :  { %v439_v52 = vadd.f32 %v438_v51, %v108_v43 }
 0x1ad   :  { %v441_v0 = vsel %vm114_vm1, %v411_v61, -inf }
 0x1ae   :  { %v444_v54 = vsel %vm114_vm1, %v439_v52, -inf }
 0x1af   :  { %445 = vmax.xlane.f32.xlu2 %v444_v54 }
 0x1b2   :  { %600 = vrot.lane.b32.xlu0 %v934_v6, %s892_s9  ;;  %v551_v60 = vpop.f32.mrf.mxu2 }
 0x1b3   :  { %v579_v56 = vpop.f32.mrf.mxu0  ;;  %v552_v62 = vadd.f32 %v551_v60, %v107_v38 }
 0x1b4   :  { %v580_v57 = vadd.f32 %v579_v56, %v108_v43 }
 0x1b5   :  { %v582_v63 = vsel %vm114_vm1, %v552_v62, -inf }
 0x1b6   :  { %v585_v58 = vsel %vm114_vm1, %v580_v57, -inf }
 0x1b7   :  { %586 = vmax.xlane.f32.xlu1 %v585_v58  ;;  %304 = vmax.xlane.f32.xlu2 %v303_v59 }
 0x1bf   :  { %583 = vmax.xlane.f32.xlu1 %v582_v63  ;;  %442 = vmax.xlane.f32.xlu2 %v441_v0 }
 0x1d7   :  { %749 = vrot.lane.b32.xlu2 %v950_v10, %s893_s10 }
 0x1d8   :  { %626 = vrot.lane.b32.xlu1 %v938_v7, %s892_s9 }
 0x202   :  { %v170_v1 = vpop.xlane.xlu2 %169 }
 0x203   :  { %v174_v2 = vsub.f32 %v138_v40, %v170_v1 }
 0x205   :  { %v176_v3 = vmul.f32 1.442695, %v174_v2 }
 0x207   :  { %753 = vpow2.f32 %v176_v3 }
 0x20d   :  { %v754_v4 = vpop.eup %753 }
 0x20e   :  { %698 = vmatmul.msk.f32.vlgmr.msra.gmra.mxu3 %vm114_vm1, %v754_v4  ;;  %v180_v6 = vsel %vm114_vm1, %v754_v4, 0.0 }
 0x20f   :  { %339 = vmatpush.msra.mxu3 %v746_v5  ;;  %181 = vadd.xlane.f32.xlu0 %v180_v6 }
 0x210   :  { %v302_v8 = vpop.xlane.xlu1 %301 }
 0x211   :  { %v306_v9 = vsub.f32 %v270_v45, %v302_v8  ;;  %v173_v11 = vpop.xlane.xlu0 %172 }
 0x212   :  { %v175_v12 = vsub.f32 %v166_v47, %v173_v11 }
 0x213   :  { %v308_v10 = vmul.f32 1.442695, %v306_v9 }
 0x214   :  { %v178_v13 = vmul.f32 1.442695, %v175_v12 }
 0x215   :  { %755 = vpow2.f32 %v308_v10 }
 0x216   :  { %757 = vpow2.f32 %v178_v13 }
 0x21b   :  { %v756_v7 = vpop.eup %755 }
 0x21c   :  { %v758_v14 = vpop.eup %757  ;;  %v312_v15 = vsel %vm114_vm1, %v756_v7, 0.0 }
 0x21d   :  { %313 = vadd.xlane.f32.xlu0 %v312_v15  ;;  %699 = vmatmul.msk.f32.vlgmr.msrb.gmra.mxu3 %vm114_vm1, %v758_v14  ;;  %v183_v45 = vsel %vm114_vm1, %v758_v14, 0.0 }
 0x222   :  { %v446_v16 = vpop.xlane.xlu2 %445 }
 0x223   :  { %v448_v17 = vsub.f32 %v439_v52, %v446_v16 }
 0x224   :  { %v601_v40 = vpop.permute.xlu0 %600 }
 0x225   :  { %v451_v18 = vmul.f32 1.442695, %v448_v17  ;;  %704 = vmatmul.msk.f32.vlgmr.msra.gmra.mxu3 %vm114_vm1, %v756_v7 }
 0x227   :  { %759 = vpow2.f32 %v451_v18 }
 0x22a   :  { %v587_v19 = vpop.xlane.xlu1 %586  ;;  %v305_v20 = vpop.xlane.xlu2 %304 }
 0x22b   :  { %v589_v21 = vsub.f32 %v580_v57, %v587_v19  ;;  %v307_v22 = vsub.f32 %v298_v55, %v305_v20 }
 0x22d   :  { %v760_v23 = vpop.eup %759  ;;  %v592_v24 = vmul.f32 1.442695, %v589_v21  ;;  %v310_v25 = vmul.f32 1.442695, %v307_v22 }
 0x22e   :  { %v456_v26 = vsel %vm114_vm1, %v760_v23, 0.0 }
 0x22f   :  { %761 = vpow2.f32 %v592_v24  ;;  %457 = vadd.xlane.f32.xlu0 %v456_v26 }
 0x230   :  { %763 = vpow2.f32 %v310_v25 }
 0x232   :  { %v584_v27 = vpop.xlane.xlu1 %583  ;;  %v443_v28 = vpop.xlane.xlu2 %442 }
 0x233   :  { %v588_v29 = vsub.f32 %v552_v62, %v584_v27  ;;  %v447_v30 = vsub.f32 %v411_v61, %v443_v28 }
 0x235   :  { %v762_v31 = vpop.eup %761  ;;  %v590_v32 = vmul.f32 1.442695, %v588_v29  ;;  %v449_v33 = vmul.f32 1.442695, %v447_v30 }
 0x236   :  { %v764_v34 = vpop.eup %763  ;;  %v597_v35 = vsel %vm114_vm1, %v762_v31, 0.0 }
 0x237   :  { %765 = vpow2.f32 %v590_v32  ;;  %705 = vmatmul.msk.f32.vlgmr.msra.gmra.mxu1 %vm114_vm1, %v764_v34  ;;  %598 = vadd.xlane.f32.xlu2 %v597_v35  ;;  %v315_v43 = vsel %vm114_vm1, %v764_v34, 0.0 }
 0x238   :  { %767 = vpow2.f32 %v449_v33 }
 0x23a   :  { %v750_v36 = vpop.permute.xlu2 %749 }
 0x23b   :  { %v752_v37 = vunpack.i.h.bf16 %v750_v36  ;;  %v751_v38 = vunpack.i.l.bf16 %v750_v36 }
 0x23d   :  { %v766_v39 = vpop.eup %765  ;;  %480 = vmatpush.msrb.mxu3 %v751_v38  ;;  %506 = vmatpush.msrb.mxu1 %v752_v37 }
 0x23e   :  { %v768_v41 = vpop.eup %767  ;;  %v594_v42 = vsel %vm114_vm1, %v766_v39, 0.0 }
 0x23f   :  { %621 = vmatpush.msra.mxu3 %v601_v40  ;;  %711 = vmatmul.msk.f32.vlgmr.msrb.gmra.mxu1 %vm114_vm1, %v760_v23  ;;  %v453_v44 = vsel %vm114_vm1, %v768_v41, 0.0 }
 0x240   :  { %710 = vmatmul.msk.f32.vlgmr.msrb.gmra.mxu3 %vm114_vm1, %v768_v41  ;;  %316 = vadd.xlane.f32.xlu2 %v315_v43 }
 0x241   :  { %454 = vadd.xlane.f32.xlu1 %v453_v44  ;;  %595 = vadd.xlane.f32.xlu0 %v594_v42 }
 0x248   :  { %716 = vmatmul.msk.f32.vlgmr.msra.gmra.mxu3 %vm114_vm1, %v766_v39  ;;  %184 = vadd.xlane.f32.xlu2 %v183_v45 }
 0x24a   :  { %v627_v46 = vpop.permute.xlu1 %626 }
 0x24b   :  { %647 = vmatpush.msra.mxu1 %v627_v46 }
 0x24c   :  { %717 = vmatmul.msk.f32.vlgmr.msra.gmra.mxu1 %vm114_vm1, %v762_v31 }
 0x282   :  { %v182_v47 = vpop.xlane.xlu0 %181 }
 0x283   :  { %769 = vrcp.f32 %v182_v47 }
 0x289   :  { %v770_v48 = vpop.eup %769 }
 0x290   :  { %v314_v51 = vpop.xlane.xlu0 %313 }
 0x291   :  { %v209_v49 = vpop.f32.mrf.mxu3  ;;  %771 = vrcp.f32 %v314_v51 }
 0x292   :  { %v240_v50 = vmul.f32 %v770_v48, %v209_v49 }
 0x294   :  { %242 = vst.msk [vmem:[#allocation2] sm:$0xff] %vm114_vm1, %v240_v50 }
 0x297   :  { %v772_v53 = vpop.eup %771 }
 0x2a0   :  { %v235_v52 = vpop.f32.mrf.mxu3 }
 0x2a2   :  { %v458_v60 = vpop.xlane.xlu0 %457 }
 0x2a8   :  { %v341_v54 = vpop.f32.mrf.mxu3 }
 0x2a9   :  { %v372_v55 = vmul.f32 %v772_v53, %v341_v54 }
 0x2aa   :  { %v599_v56 = vpop.xlane.xlu2 %598 }
 0x2ab   :  { %376 = vrot.lane.b32.xlu1 %v372_v55, %s880_s24 }
 0x2b3   :  { %v317_v57 = vpop.xlane.xlu2 %316 }
 0x2b4   :  { %773 = vrcp.f32 %v317_v57  ;;  %v367_v58 = vpop.f32.mrf.mxu1  ;;  %v455_v59 = vpop.xlane.xlu1 %454 }
 0x2b5   :  { %775 = vrcp.f32 %v455_v59  ;;  %v596_v1 = vpop.xlane.xlu0 %595 }
 0x2ba   :  { %v774_v61 = vpop.eup %773 }
 0x2bb   :  { %v185_v62 = vpop.xlane.xlu2 %184  ;;  %v373_v63 = vmul.f32 %v774_v61, %v367_v58  ;;  %v776_v0 = vpop.eup %775 }
 0x2bc   :  { %777 = vrcp.f32 %v185_v62  ;;  %v508_v2 = vpop.f32.mrf.mxu1 }
 0x2bd   :  { %779 = vrcp.f32 %v458_v60  ;;  %378 = vrot.lane.b32.xlu0 %v373_v63, %s880_s24 }
 0x2be   :  { %781 = vrcp.f32 %v599_v56 }
 0x2bf   :  { %783 = vrcp.f32 %v596_v1 }
 0x2c2   :  { %v778_v3 = vpop.eup %777 }
 0x2c3   :  { %v482_v4 = vpop.f32.mrf.mxu3  ;;  %v780_v5 = vpop.eup %779  ;;  %v241_v6 = vmul.f32 %v778_v3, %v235_v52 }
 0x2c4   :  { %v513_v8 = vmul.f32 %v776_v0, %v482_v4  ;;  %v514_v9 = vmul.f32 %v780_v5, %v508_v2  ;;  %v782_v11 = vpop.eup %781 }
 0x2c5   :  { %243 = vst.msk [vmem:[#allocation2 + $0x8] sm:$0xff] %vm114_vm1, %v241_v6  ;;  %v784_v10 = vpop.eup %783 }
 0x2c6   :  { %517 = vrot.lane.b32.xlu2 %v513_v8, %s894_s11  ;;  %519 = vrot.lane.b32.xlu0 %v514_v9, %s894_s11 }
 0x2c9   :  { %v649_v12 = vpop.f32.mrf.mxu1 }
 0x2ca   :  { %v655_v7 = vmul.f32 %v782_v11, %v649_v12 }
 0x2cb   :  { %v623_v13 = vpop.f32.mrf.mxu3 }
 0x2cc   :  { %v654_v14 = vmul.f32 %v784_v10, %v623_v13 }
 0x2ce   :  { %660 = vrot.lane.b32.xlu2 %v655_v7, %s895_s12  ;;  %658 = vrot.lane.b32.xlu1 %v654_v14, %s895_s12 }
 0x31d   :  { %v377_v15 = vpop.permute.xlu1 %376 }
 0x31e   :  { %383 = vst.msk [vmem:[#allocation2] sm:$0xff] %vm382_vm5, %v377_v15 }
 0x320   :  { %v518_v16 = vpop.permute.xlu2 %517 }
 0x321   :  { %524 = vst.msk [vmem:[#allocation2] sm:$0xff] %vm523_vm6, %v518_v16 }
 0x328   :  { %v661_v19 = vpop.permute.xlu2 %660 }
 0x32f   :  { %v379_v17 = vpop.permute.xlu0 %378 }
 0x330   :  { %384 = vst.msk [vmem:[#allocation2 + $0x8] sm:$0xff] %vm382_vm5, %v379_v17 }
 0x338   :  { %v520_v18 = vpop.permute.xlu0 %519 }
 0x339   :  { %525 = vst.msk [vmem:[#allocation2 + $0x8] sm:$0xff] %vm523_vm6, %v520_v18 }
 0x33a   :  { %666 = vst.msk [vmem:[#allocation2 + $0x8] sm:$0xff] %vm664_vm7, %v661_v19 }
 0x340   :  { %v659_v20 = vpop.permute.xlu1 %658 }
 0x341   :  { %665 = vst.msk [vmem:[#allocation2] sm:$0xff] %vm664_vm7, %v659_v20  ;;  %v668_v21 = vld [vmem:[#allocation2 + $0x8] sm:$0xff] }
 0x342   :  { %670 = vst.msk [vmem:[#allocation10 + $0x8] sm:$0xff] %vm59_vm0, %v668_v21 }
 0x348   :  { %v667_v22 = vld [vmem:[#allocation2] sm:$0xff] }
 0x349   :  { %669 = vst.msk [vmem:[#allocation10] sm:$0xff] %vm59_vm0, %v667_v22 }
 0x34a   :  { %683 = dma.vmem_to_hbm [thread:$0]  %s676_s14, 256, %s678_s17, [#allocation7], %s879_s23, %s879_s23, %s880_s24  }
 0x34b   :  { %875 = dma.done.wait [#allocation7], 256  }
 0x34c   :  { %876 = vsyncadd [#allocation7], 4294967040 }
 0x34d   :  { %688 = vsyncpa [#allocation6], 1 }
 0x34e   :  { %689 = vsyncpa [#allocation9], 1 }
 0x34f   :  { %690 = vsyncpa [#allocation7], 1 }

// kernel: tpu_custom_call.1
= control target key start
LH: loop header
LB: loop body
LE: loop exit
PB: predicated region body
PF: predicated region fallthrough
CT: control target
= control target key end

     0   :  { %s877_s15 = smov [#allocation4]   ;;  %s1013_s0 = inlined_call_operand.hbm [shape: s32[2], index: 0, kind: input, shape index: {}]   ;;  %s1014_s1 = inlined_call_operand.hbm [shape: f32[2,8,32], index: 1, kind: input, shape index: {}]   ;;  %s1015_s2 = inlined_call_operand.hbm [shape: f32[32,96], index: 2, kind: input, shape index: {}]   ;;  %s1016_s3 = inlined_call_operand.hbm [shape: f32[2,8,32], index: 3, kind: output, shape index: {}]  }
   0x1   :  { %s9_s14 = sshll.u32 %s1013_s0, 4  ;;  %s10_s14 = int_to_ptr.hbm [resolvable:$true] %s9_s14 }
   0x2   :  { %12 = dma.hbm_to_smem %s10_s14, 16, %s877_s15, [#allocation3] }
   0x3   :  { %869 = dma.done.wait [#allocation3], 16 }
   0x4   :  { %870 = vsyncadd [#allocation3], 4294967280 }
   0x5   :  { %15 = sfence }
   0x6   :  { %16 = vsyncpa [#allocation6], 0 }
   0x7   :  { %17 = vsyncpa [#allocation9], 0 }
   0x8   :  { %18 = vsyncpa [#allocation7], 0  ;;  %s23_s18 = sshll.u32 %s1014_s1, 4  ;;  %s878_s19 = smov [#allocation5]   ;;  %s24_s18 = int_to_ptr.hbm [resolvable:$true] %s23_s18 }
   0x9   :  { %s25_s20 = sshll.u32 %s878_s19, 4  ;;  %s36_s0 = sshll.u32 %s1015_s2, 4  ;;  %s26_s20 = int_to_ptr.vmem [resolvable:$true] %s25_s20  ;;  %s37_s0 = int_to_ptr.hbm [resolvable:$true] %s36_s0 }
   0xa   :  { %s879_s23 = smov 128   ;;  %s880_s24 = smov 8  }
   0xb   :  { %31 = dma.hbm_to_vmem [thread:$0]  %s24_s18, 256, %s26_s20, [#allocation6], %s879_s23, %s879_s23, %s880_s24  }
   0xc   :  { %s881_s25 = smov [#allocation8]  }
   0xd   :  { %s38_s26 = sshll.u32 %s881_s25, 4  ;;  %s39_s26 = int_to_ptr.vmem [resolvable:$true] %s38_s26 }
   0xe   :  { %44 = dma.hbm_to_vmem [thread:$0]  %s37_s0, 512, %s39_s26, [#allocation9], %s879_s23, %s879_s23, %s880_s24  }
   0xf   :  { %871 = dma.done.wait [#allocation6], 256  }
  0x10   :  { %872 = vsyncadd [#allocation6], 4294967040 }
  0x11   :  { %873 = dma.done.wait [#allocation9], 512  }
  0x12   :  { %874 = vsyncadd [#allocation9], 4294966784  ;;  %v58_v0 = vld [vmem:[#allocation8 + $0x18] sm:$0xff]  ;;  %v57_v1 = vld [vmem:[#allocation8 + $0x10] sm:$0xff]  ;;  %vm59_vm0 = vcmask 261120   ;;  %s882_s1 = smov 88   ;;  %v92_v30 = vlaneseq }
  0x13   :  { %78 = vmatpush.msra.mxu0 %v58_v0  ;;  %v56_v2 = vld [vmem:[#allocation8 + $0x8] sm:$0xff]  ;;  %v55_v3 = vld [vmem:[#allocation8] sm:$0xff]  ;;  %v53_v4 = vld [vmem:[#allocation5] sm:$0xff]  ;;  %s883_s2 = smov 96   ;;  %s884_s27 = smov 80   ;;  %vm114_vm1 = vcmask 64512  }
  0x14   :  { %v54_v5 = vld [vmem:[#allocation5 + $0x8] sm:$0xff]  ;;  %s885_s28 = smov 72   ;;  %s886_s29 = smov 120   ;;  %v93_v31 = vand.u32 127, %v92_v30  ;;  %v891_v34 = vmov 0.0   ;;  %vm103_vm4 = vcmask 1040384  }
  0x15   :  { %79 = vmatpush.msra.mxu0 %v57_v1  ;;  %s887_s30 = smov 112   ;;  %s888_s4 = smov 104   ;;  %vm382_vm5 = vcmask 130112   ;;  %vm523_vm6 = vcmask 195712   ;;  %vm664_vm7 = vcmask 261312  }
  0x16   :  { %s889_s5 = smov 56   ;;  %s890_s6 = smov 64  }
  0x17   :  { %80 = vmatpush.msra.mxu0 %v56_v2  ;;  %s94_s7 = sld [smem:[#allocation4]]  ;;  %s892_s9 = smov 40  }
  0x18   :  { %s693_s8 = sld [smem:[#allocation4 + $0x1]]  ;;  %s893_s10 = smov 48  }
  0x19   :  { %81 = vmatpush.msra.mxu0 %v55_v3  ;;  %s894_s11 = smov 16   ;;  %s895_s12 = smov 24  }
  0x1a   :  { %691 = vmatmul.msk.f32.vlgmr.msra.gmra.mxu0 %vm59_vm0, %v53_v4  ;;  %s896_s13 = smov [#allocation10]   ;;  %s677_s17 = sshll.u32 %s1016_s3, 4  ;;  %s678_s17 = int_to_ptr.hbm [resolvable:$true] %s677_s17 }
  0x1b   :  { %s675_s14 = sshll.u32 %s896_s13, 4  ;;  %s676_s14 = int_to_ptr.vmem [resolvable:$true] %s675_s14 }
  0x1d   :  { %v95_v32 = vstv %s94_s7 }
  0x1e   :  { %v100_v33 = vstv %s693_s8  ;;  %vm96_vm2 = vcmp.ge.s32.totalorder %v93_v31, %v95_v32 }
  0x1f   :  { %vm101_vm3 = vcmp.ge.s32.totalorder %v93_v31, %v100_v33  ;;  %v97_v35 = vsel %vm96_vm2, -1e+09, %v891_v34 }
  0x20   :  { %v102_v36 = vsel %vm101_vm3, -1e+09, %v891_v34 }
  0x21   :  { %v104_v37 = vsel %vm103_vm4, %v97_v35, %v102_v36 }
  0x22   :  { %692 = vmatmul.msk.f32.gmra.mxu0 %vm59_vm0, %v54_v5  ;;  %v107_v38 = vperm.slane %v104_v37, 0  ;;  %v106_v42 = vrot.slane %v104_v37, 1 }
  0x24   :  { %v108_v43 = vperm.slane %v106_v42, 0 }
  0x97   :  { %v934_v6 = vpop.f32.mrf.mxu0 }
  0x98   :  { %246 = vrot.lane.b32.xlu2 %v934_v6, %s882_s1  ;;  %112 = vrot.lane.b32.xlu0 %v934_v6, %s883_s2  ;;  %v89_v9 = vmul.f32 0.35355338, %v934_v6 }
  0x9f   :  { %v938_v7 = vpop.f32.mrf.mxu0 }
  0xa0   :  { %387 = vrot.lane.b32.xlu2 %v934_v6, %s884_s27  ;;  %274 = vrot.lane.b32.xlu1 %v938_v7, %s882_s1  ;;  %v90_v8 = vmul.f32 0.35355338, %v938_v7  ;;  %v950_v10 = vpack.i.bf16 %v938_v7, %v934_v6 }
  0xa1   :  { %141 = vrot.lane.b32.xlu0 %v938_v7, %s883_s2 }
  0xa8   :  { %528 = vrot.lane.b32.xlu2 %v934_v6, %s885_s28  ;;  %272 = vrot.lane.b32.xlu1 %v90_v8, %s886_s29 }
  0xa9   :  { %244 = vrot.lane.b32.xlu0 %v89_v9, %s886_s29 }
  0xb0   :  { %413 = vrot.lane.b32.xlu2 %v90_v8, %s887_s30  ;;  %385 = vrot.lane.b32.xlu1 %v89_v9, %s887_s30 }
  0xb1   :  { %526 = vrot.lane.b32.xlu0 %v89_v9, %s888_s4 }
  0xb8   :  { %415 = vrot.lane.b32.xlu1 %v938_v7, %s884_s27 }
  0xb9   :  { %556 = vrot.lane.b32.xlu0 %v938_v7, %s885_s28 }
  0xc0   :  { %554 = vrot.lane.b32.xlu1 %v90_v8, %s888_s4 }
  0xc1   :  { %744 = vrot.lane.b32.xlu0 %v950_v10, %s889_s5 }
  0xc8   :  { %739 = vrot.lane.b32.xlu1 %v950_v10, %s890_s6 }
  0xf2   :  { %v247_v12 = vpop.permute.xlu2 %246 }
  0xfa   :  { %v388_v15 = vpop.permute.xlu2 %387 }
 0x102   :  { %v529_v18 = vpop.permute.xlu2 %528 }
 0x10a   :  { %v113_v11 = vpop.permute.xlu0 %112  ;;  %v414_v23 = vpop.permute.xlu2 %413 }
 0x10b   :  { %694 = vmatpush.xpose.msk.msra.mxu1 %vm114_vm1, %v113_v11 }
 0x10e   :  { %695 = vmatmul.msk.f32.vlgmr.msra.gmra.mxu1 %vm114_vm1, %v89_v9 }
 0x10f   :  { %700 = vmatpush.xpose.msk.msrb.mxu1 %vm114_vm1, %v247_v12 }
 0x112   :  { %v275_v13 = vpop.permute.xlu1 %274 }
 0x113   :  { %v142_v14 = vpop.permute.xlu0 %141 }
 0x114   :  { %696 = vmatpush.xpose.msk.msra.mxu2 %vm114_vm1, %v142_v14 }
 0x117   :  { %697 = vmatmul.msk.f32.vlgmr.msra.gmra.mxu2 %vm114_vm1, %v90_v8 }
 0x118   :  { %702 = vmatpush.xpose.msk.msrb.mxu2 %vm114_vm1, %v275_v13 }
 0x11a   :  { %v273_v16 = vpop.permute.xlu1 %272 }
 0x11b   :  { %v245_v17 = vpop.permute.xlu0 %244 }
 0x11c   :  { %706 = vmatpush.xpose.msk.msra.mxu2 %vm114_vm1, %v388_v15  ;;  %701 = vmatmul.msk.f32.vlgmr.msrb.gmra.mxu1 %vm114_vm1, %v245_v17 }
 0x11f   :  { %703 = vmatmul.msk.f32.vlgmr.msrb.gmra.mxu2 %vm114_vm1, %v273_v16 }
 0x120   :  { %712 = vmatpush.xpose.msk.msrb.mxu2 %vm114_vm1, %v529_v18 }
 0x122   :  { %v386_v19 = vpop.permute.xlu1 %385 }
 0x123   :  { %v527_v20 = vpop.permute.xlu0 %526 }
 0x127   :  { %707 = vmatmul.msk.f32.vlgmr.msra.gmra.mxu2 %vm114_vm1, %v386_v19 }
 0x12a   :  { %v416_v21 = vpop.permute.xlu1 %415 }
 0x12b   :  { %v557_v22 = vpop.permute.xlu0 %556  ;;  %708 = vmatpush.xpose.msk.msrb.mxu0 %vm114_vm1, %v416_v21 }
 0x12e   :  { %709 = vmatmul.msk.f32.vlgmr.msrb.gmra.mxu0 %vm114_vm1, %v414_v23 }
 0x12f   :  { %714 = vmatpush.xpose.msk.msra.mxu0 %vm114_vm1, %v557_v22  ;;  %713 = vmatmul.msk.f32.vlgmr.msrb.gmra.mxu2 %vm114_vm1, %v527_v20 }
 0x132   :  { %v555_v24 = vpop.permute.xlu1 %554 }
 0x133   :  { %v969_v25 = vpop.permute.xlu0 %744 }
 0x134   :  { %v747_v26 = vunpack.i.h.bf16 %v969_v25  ;;  %v746_v5 = vunpack.i.l.bf16 %v969_v25 }
 0x136   :  { %365 = vmatpush.msra.mxu1 %v747_v26  ;;  %715 = vmatmul.msk.f32.vlgmr.msra.gmra.mxu0 %vm114_vm1, %v555_v24 }
 0x13a   :  { %v740_v27 = vpop.permute.xlu1 %739 }
 0x13b   :  { %v741_v28 = vunpack.i.l.bf16 %v740_v27  ;;  %v742_v29 = vunpack.i.h.bf16 %v740_v27 }
 0x13d   :  { %207 = vmatpush.msra.mxu3 %v741_v28 }
 0x13f   :  { %233 = vmatpush.msrb.mxu3 %v742_v29 }
 0x18b   :  { %v137_v39 = vpop.f32.mrf.mxu1 }
 0x18c   :  { %v138_v40 = vadd.f32 %v137_v39, %v107_v38 }
 0x18e   :  { %v168_v41 = vsel %vm114_vm1, %v138_v40, -inf }
 0x18f   :  { %169 = vmax.xlane.f32.xlu2 %v168_v41 }
 0x199   :  { %v269_v44 = vpop.f32.mrf.mxu1 }
 0x19a   :  { %v270_v45 = vadd.f32 %v269_v44, %v107_v38  ;;  %v165_v46 = vpop.f32.mrf.mxu2 }
 0x19b   :  { %v166_v47 = vadd.f32 %v165_v46, %v108_v43 }
 0x19c   :  { %v300_v48 = vsel %vm114_vm1, %v270_v45, -inf }
 0x19d   :  { %301 = vmax.xlane.f32.xlu1 %v300_v48  ;;  %v171_v49 = vsel %vm114_vm1, %v166_v47, -inf }
 0x19e   :  { %172 = vmax.xlane.f32.xlu0 %v171_v49 }
 0x1a2   :  { %v297_v50 = vpop.f32.mrf.mxu2 }
 0x1a3   :  { %v298_v55 = vadd.f32 %v297_v50, %v108_v43 }
 0x1a5   :  { %v303_v59 = vsel %vm114_vm1, %v298_v55, -inf }
 0x1aa   :  { %v410_v53 = vpop.f32.mrf.mxu2 }
 0x1ab   :  { %v438_v51 = vpop.f32.mrf.mxu0  ;;  %v411_v61 = vadd.f32 %v410_v53, %v107_v38 }
 0x1ac   :  { %v439_v52 = vadd.f32 %v438_v51, %v108_v43 }
 0x1ad   :  { %v441_v0 = vsel %vm114_vm1, %v411_v61, -inf }
 0x1ae   :  { %v444_v54 = vsel %vm114_vm1, %v439_v52, -inf }
 0x1af   :  { %445 = vmax.xlane.f32.xlu2 %v444_v54 }
 0x1b2   :  { %600 = vrot.lane.b32.xlu0 %v934_v6, %s892_s9  ;;  %v551_v60 = vpop.f32.mrf.mxu2 }
 0x1b3   :  { %v579_v56 = vpop.f32.mrf.mxu0  ;;  %v552_v62 = vadd.f32 %v551_v60, %v107_v38 }
 0x1b4   :  { %v580_v57 = vadd.f32 %v579_v56, %v108_v43 }
 0x1b5   :  { %v582_v63 = vsel %vm114_vm1, %v552_v62, -inf }
 0x1b6   :  { %v585_v58 = vsel %vm114_vm1, %v580_v57, -inf }
 0x1b7   :  { %586 = vmax.xlane.f32.xlu1 %v585_v58  ;;  %304 = vmax.xlane.f32.xlu2 %v303_v59 }
 0x1bf   :  { %583 = vmax.xlane.f32.xlu1 %v582_v63  ;;  %442 = vmax.xlane.f32.xlu2 %v441_v0 }
 0x1d7   :  { %749 = vrot.lane.b32.xlu2 %v950_v10, %s893_s10 }
 0x1d8   :  { %626 = vrot.lane.b32.xlu1 %v938_v7, %s892_s9 }
 0x202   :  { %v170_v1 = vpop.xlane.xlu2 %169 }
 0x203   :  { %v174_v2 = vsub.f32 %v138_v40, %v170_v1 }
 0x205   :  { %v176_v3 = vmul.f32 1.442695, %v174_v2 }
 0x207   :  { %753 = vpow2.f32 %v176_v3 }
 0x20d   :  { %v754_v4 = vpop.eup %753 }
 0x20e   :  { %698 = vmatmul.msk.f32.vlgmr.msra.gmra.mxu3 %vm114_vm1, %v754_v4  ;;  %v180_v6 = vsel %vm114_vm1, %v754_v4, 0.0 }
 0x20f   :  { %339 = vmatpush.msra.mxu3 %v746_v5  ;;  %181 = vadd.xlane.f32.xlu0 %v180_v6 }
 0x210   :  { %v302_v8 = vpop.xlane.xlu1 %301 }
 0x211   :  { %v306_v9 = vsub.f32 %v270_v45, %v302_v8  ;;  %v173_v11 = vpop.xlane.xlu0 %172 }
 0x212   :  { %v175_v12 = vsub.f32 %v166_v47, %v173_v11 }
 0x213   :  { %v308_v10 = vmul.f32 1.442695, %v306_v9 }
 0x214   :  { %v178_v13 = vmul.f32 1.442695, %v175_v12 }
 0x215   :  { %755 = vpow2.f32 %v308_v10 }
 0x216   :  { %757 = vpow2.f32 %v178_v13 }
 0x21b   :  { %v756_v7 = vpop.eup %755 }
 0x21c   :  { %v758_v14 = vpop.eup %757  ;;  %v312_v15 = vsel %vm114_vm1, %v756_v7, 0.0 }
 0x21d   :  { %313 = vadd.xlane.f32.xlu0 %v312_v15  ;;  %699 = vmatmul.msk.f32.vlgmr.msrb.gmra.mxu3 %vm114_vm1, %v758_v14  ;;  %v183_v45 = vsel %vm114_vm1, %v758_v14, 0.0 }
 0x222   :  { %v446_v16 = vpop.xlane.xlu2 %445 }
 0x223   :  { %v448_v17 = vsub.f32 %v439_v52, %v446_v16 }
 0x224   :  { %v601_v40 = vpop.permute.xlu0 %600 }
 0x225   :  { %v451_v18 = vmul.f32 1.442695, %v448_v17  ;;  %704 = vmatmul.msk.f32.vlgmr.msra.gmra.mxu3 %vm114_vm1, %v756_v7 }
 0x227   :  { %759 = vpow2.f32 %v451_v18 }
 0x22a   :  { %v587_v19 = vpop.xlane.xlu1 %586  ;;  %v305_v20 = vpop.xlane.xlu2 %304 }
 0x22b   :  { %v589_v21 = vsub.f32 %v580_v57, %v587_v19  ;;  %v307_v22 = vsub.f32 %v298_v55, %v305_v20 }
 0x22d   :  { %v760_v23 = vpop.eup %759  ;;  %v592_v24 = vmul.f32 1.442695, %v589_v21  ;;  %v310_v25 = vmul.f32 1.442695, %v307_v22 }
 0x22e   :  { %v456_v26 = vsel %vm114_vm1, %v760_v23, 0.0 }
 0x22f   :  { %761 = vpow2.f32 %v592_v24  ;;  %457 = vadd.xlane.f32.xlu0 %v456_v26 }
 0x230   :  { %763 = vpow2.f32 %v310_v25 }
 0x232   :  { %v584_v27 = vpop.xlane.xlu1 %583  ;;  %v443_v28 = vpop.xlane.xlu2 %442 }
 0x233   :  { %v588_v29 = vsub.f32 %v552_v62, %v584_v27  ;;  %v447_v30 = vsub.f32 %v411_v61, %v443_v28 }
 0x235   :  { %v762_v31 = vpop.eup %761  ;;  %v590_v32 = vmul.f32 1.442695, %v588_v29  ;;  %v449_v33 = vmul.f32 1.442695, %v447_v30 }
 0x236   :  { %v764_v34 = vpop.eup %763  ;;  %v597_v35 = vsel %vm114_vm1, %v762_v31, 0.0 }
 0x237   :  { %765 = vpow2.f32 %v590_v32  ;;  %705 = vmatmul.msk.f32.vlgmr.msra.gmra.mxu1 %vm114_vm1, %v764_v34  ;;  %598 = vadd.xlane.f32.xlu2 %v597_v35  ;;  %v315_v43 = vsel %vm114_vm1, %v764_v34, 0.0 }
 0x238   :  { %767 = vpow2.f32 %v449_v33 }
 0x23a   :  { %v750_v36 = vpop.permute.xlu2 %749 }
 0x23b   :  { %v752_v37 = vunpack.i.h.bf16 %v750_v36  ;;  %v751_v38 = vunpack.i.l.bf16 %v750_v36 }
 0x23d   :  { %v766_v39 = vpop.eup %765  ;;  %480 = vmatpush.msrb.mxu3 %v751_v38  ;;  %506 = vmatpush.msrb.mxu1 %v752_v37 }
 0x23e   :  { %v768_v41 = vpop.eup %767  ;;  %v594_v42 = vsel %vm114_vm1, %v766_v39, 0.0 }
 0x23f   :  { %621 = vmatpush.msra.mxu3 %v601_v40  ;;  %711 = vmatmul.msk.f32.vlgmr.msrb.gmra.mxu1 %vm114_vm1, %v760_v23  ;;  %v453_v44 = vsel %vm114_vm1, %v768_v41, 0.0 }
 0x240   :  { %710 = vmatmul.msk.f32.vlgmr.msrb.gmra.mxu3 %vm114_vm1, %v768_v41  ;;  %316 = vadd.xlane.f32.xlu2 %v315_v43 }
 0x241   :  { %454 = vadd.xlane.f32.xlu1 %v453_v44  ;;  %595 = vadd.xlane.f32.xlu0 %v594_v42 }
 0x248   :  { %716 = vmatmul.msk.f32.vlgmr.msra.gmra.mxu3 %vm114_vm1, %v766_v39  ;;  %184 = vadd.xlane.f32.xlu2 %v183_v45 }
 0x24a   :  { %v627_v46 = vpop.permute.xlu1 %626 }
 0x24b   :  { %647 = vmatpush.msra.mxu1 %v627_v46 }
 0x24c   :  { %717 = vmatmul.msk.f32.vlgmr.msra.gmra.mxu1 %vm114_vm1, %v762_v31 }
 0x282   :  { %v182_v47 = vpop.xlane.xlu0 %181 }
 0x283   :  { %769 = vrcp.f32 %v182_v47 }
 0x289   :  { %v770_v48 = vpop.eup %769 }
 0x290   :  { %v314_v51 = vpop.xlane.xlu0 %313 }
 0x291   :  { %v209_v49 = vpop.f32.mrf.mxu3  ;;  %771 = vrcp.f32 %v314_v51 }
 0x292   :  { %v240_v50 = vmul.f32 %v770_v48, %v209_v49 }
 0x294   :  { %242 = vst.msk [vmem:[#allocation2] sm:$0xff] %vm114_vm1, %v240_v50 }
 0x297   :  { %v772_v53 = vpop.eup %771 }
 0x2a0   :  { %v235_v52 = vpop.f32.mrf.mxu3 }
 0x2a2   :  { %v458_v60 = vpop.xlane.xlu0 %457 }
 0x2a8   :  { %v341_v54 = vpop.f32.mrf.mxu3 }
 0x2a9   :  { %v372_v55 = vmul.f32 %v772_v53, %v341_v54 }
 0x2aa   :  { %v599_v56 = vpop.xlane.xlu2 %598 }
 0x2ab   :  { %376 = vrot.lane.b32.xlu1 %v372_v55, %s880_s24 }
 0x2b3   :  { %v317_v57 = vpop.xlane.xlu2 %316 }
 0x2b4   :  { %773 = vrcp.f32 %v317_v57  ;;  %v367_v58 = vpop.f32.mrf.mxu1  ;;  %v455_v59 = vpop.xlane.xlu1 %454 }
 0x2b5   :  { %775 = vrcp.f32 %v455_v59  ;;  %v596_v1 = vpop.xlane.xlu0 %595 }
 0x2ba   :  { %v774_v61 = vpop.eup %773 }
 0x2bb   :  { %v185_v62 = vpop.xlane.xlu2 %184  ;;  %v373_v63 = vmul.f32 %v774_v61, %v367_v58  ;;  %v776_v0 = vpop.eup %775 }
 0x2bc   :  { %777 = vrcp.f32 %v185_v62  ;;  %v508_v2 = vpop.f32.mrf.mxu1 }
 0x2bd   :  { %779 = vrcp.f32 %v458_v60  ;;  %378 = vrot.lane.b32.xlu0 %v373_v63, %s880_s24 }
 0x2be   :  { %781 = vrcp.f32 %v599_v56 }
 0x2bf   :  { %783 = vrcp.f32 %v596_v1 }
 0x2c2   :  { %v778_v3 = vpop.eup %777 }
 0x2c3   :  { %v482_v4 = vpop.f32.mrf.mxu3  ;;  %v780_v5 = vpop.eup %779  ;;  %v241_v6 = vmul.f32 %v778_v3, %v235_v52 }
 0x2c4   :  { %v513_v8 = vmul.f32 %v776_v0, %v482_v4  ;;  %v514_v9 = vmul.f32 %v780_v5, %v508_v2  ;;  %v782_v11 = vpop.eup %781 }
 0x2c5   :  { %243 = vst.msk [vmem:[#allocation2 + $0x8] sm:$0xff] %vm114_vm1, %v241_v6  ;;  %v784_v10 = vpop.eup %783 }
 0x2c6   :  { %517 = vrot.lane.b32.xlu2 %v513_v8, %s894_s11  ;;  %519 = vrot.lane.b32.xlu0 %v514_v9, %s894_s11 }
 0x2c9   :  { %v649_v12 = vpop.f32.mrf.mxu1 }
 0x2ca   :  { %v655_v7 = vmul.f32 %v782_v11, %v649_v12 }
 0x2cb   :  { %v623_v13 = vpop.f32.mrf.mxu3 }
 0x2cc   :  { %v654_v14 = vmul.f32 %v784_v10, %v623_v13 }
 0x2ce   :  { %660 = vrot.lane.b32.xlu2 %v655_v7, %s895_s12  ;;  %658 = vrot.lane.b32.xlu1 %v654_v14, %s895_s12 }
 0x31d   :  { %v377_v15 = vpop.permute.xlu1 %376 }
 0x31e   :  { %383 = vst.msk [vmem:[#allocation2] sm:$0xff] %vm382_vm5, %v377_v15 }
 0x320   :  { %v518_v16 = vpop.permute.xlu2 %517 }
 0x321   :  { %524 = vst.msk [vmem:[#allocation2] sm:$0xff] %vm523_vm6, %v518_v16 }
 0x328   :  { %v661_v19 = vpop.permute.xlu2 %660 }
 0x32f   :  { %v379_v17 = vpop.permute.xlu0 %378 }
 0x330   :  { %384 = vst.msk [vmem:[#allocation2 + $0x8] sm:$0xff] %vm382_vm5, %v379_v17 }
 0x338   :  { %v520_v18 = vpop.permute.xlu0 %519 }
 0x339   :  { %525 = vst.msk [vmem:[#allocation2 + $0x8] sm:$0xff] %vm523_vm6, %v520_v18 }
 0x33a   :  { %666 = vst.msk [vmem:[#allocation2 + $0x8] sm:$0xff] %vm664_vm7, %v661_v19 }
 0x340   :  { %v659_v20 = vpop.permute.xlu1 %658 }
 0x341   :  { %665 = vst.msk [vmem:[#allocation2] sm:$0xff] %vm664_vm7, %v659_v20  ;;  %v668_v21 = vld [vmem:[#allocation2 + $0x8] sm:$0xff] }
 0x342   :  { %670 = vst.msk [vmem:[#allocation10 + $0x8] sm:$0xff] %vm59_vm0, %v668_v21 }
 0x348   :  { %v667_v22 = vld [vmem:[#allocation2] sm:$0xff] }
 0x349   :  { %669 = vst.msk [vmem:[#allocation10] sm:$0xff] %vm59_vm0, %v667_v22 }
 0x34a   :  { %683 = dma.vmem_to_hbm [thread:$0]  %s676_s14, 256, %s678_s17, [#allocation7], %s879_s23, %s879_s23, %s880_s24  }
 0x34b   :  { %875 = dma.done.wait [#allocation7], 256  }
 0x34c   :  { %876 = vsyncadd [#allocation7], 4294967040 }
 0x34d   :  { %688 = vsyncpa [#allocation6], 1 }
 0x34e   :  { %689 = vsyncpa [#allocation9], 1 }
 0x34f   :  { %690 = vsyncpa [#allocation7], 1 }

</bundles_post_ra>
